<compile_context>
chip_gen: v7x
topology: tpu7x:2x2x1
jax: 0.10.0
libtpu: 0.0.40
codegen_flags: <defaults>
</compile_context>

<pallas_src>
import functools
import math

import jax
import jax.numpy as jnp
from jax import lax
from jax.experimental import pallas as pl
from jax.experimental.pallas import tpu as pltpu

NEG_SLOPE = 0.01  # nn.LeakyReLU default


def _leaky_relu(x):
    return jnp.where(x >= 0, x, NEG_SLOPE * x)


def lstm_mlp_kernel(x_ref, r_ref,
                    wih0_ref, whh0_ref, b0_ref,
                    wih1_ref, whh1_ref, b1_ref,
                    wfc1h_ref, wfc1r_ref, bfc1_ref,
                    wfc2_ref, bfc2_ref,
                    out_ref, *, hidden_size, conditioning, seq_len, batch):
    H, T, B = hidden_size, seq_len, batch

    # ---- hoist loop-invariant weight/bias loads into vregs (read once) ----
    whh0 = whh0_ref[...]          # (H, 4H)
    wih1 = wih1_ref[...]          # (H, 4H)
    whh1 = whh1_ref[...]          # (H, 4H)
    b1 = b1_ref[...]              # (1, 4H)

    # ---- layer-0 input projection for ALL timesteps as one MXU matmul ----
    # removes T small matmuls, T dynamic x loads and T bias broadcasts from
    # the serial critical path.
    xw0 = (jnp.dot(x_ref[...], wih0_ref[...],
                   preferred_element_type=jnp.float32)
           + b0_ref[...])         # (T*B, 4H)

    def cell(pre_gates, h, c, whh):
        # PyTorch gate order: i, f, g, o.  Apply sigmoid/tanh over the full
        # (B, 4H) gates tensor (2 EUP pushes per cell instead of 4) and slice
        # the needed quarters afterwards.
        gates = pre_gates + jnp.dot(h, whh, preferred_element_type=jnp.float32)
        sig = jax.nn.sigmoid(gates)
        th = jnp.tanh(gates)
        i = sig[:, 0 * H:1 * H]
        f = sig[:, 1 * H:2 * H]
        g = th[:, 2 * H:3 * H]
        o = sig[:, 3 * H:4 * H]
        c_new = f * c + i * g
        h_new = o * jnp.tanh(c_new)
        return h_new, c_new

    z = jnp.zeros((B, H), jnp.float32)
    h0 = c0 = h1 = c1 = z
    # Static full unroll of the T-step recurrence (T is small and static):
    # gives the scheduler visibility so layer-1 at step t overlaps layer-0 at
    # step t+1, and makes every xw0 row slice a constant offset.
    for t in range(T):
        h0, c0 = cell(xw0[t * B:(t + 1) * B, :], h0, c0, whh0)
        pre1 = jnp.dot(h0, wih1, preferred_element_type=jnp.float32) + b1
        h1, c1 = cell(pre1, h1, c1, whh1)

    # ---- head: LeakyReLU(concat(h_n, r_last)) @ W1.T + b1 rewritten as
    # leaky(h) @ W_h + leaky(r) * W_r + b (elementwise LeakyReLU commutes with
    # concat), avoiding a 33-lane concat on TPU.
    hn_act = _leaky_relu(h1)
    out = (jnp.dot(hn_act, wfc1h_ref[...], preferred_element_type=jnp.float32)
           + bfc1_ref[...])
    if conditioning:
        out = out + _leaky_relu(r_ref[...]) * wfc1r_ref[...]
    out = _leaky_relu(out)
    # fc2 has a single output feature: VPU multiply + lane reduce instead of
    # an N=1 MXU matmul (full push/pop latency for one valid lane).
    out_ref[...] = (jnp.sum(out * wfc2_ref[...], axis=-1, keepdims=True)
                    + bfc2_ref[...])


def prepare_params(params, conditioning):
    """One-time fold of the PyTorch-layout params into kernel layout."""
    H = params['hidden_size']
    L = params['linear_width']
    prepped = {
        'hidden_size': H,
        'linear_width': L,
        'wih0': params['w_ih_l0'].T,                              # (F, 4H)
        'whh0': params['w_hh_l0'].T,                              # (H, 4H)
        'b0': (params['b_ih_l0'] + params['b_hh_l0']).reshape(1, 4 * H),
        'wih1': params['w_ih_l1'].T,                              # (H, 4H)
        'whh1': params['w_hh_l1'].T,                              # (H, 4H)
        'b1': (params['b_ih_l1'] + params['b_hh_l1']).reshape(1, 4 * H),
        'wfc2': params['fc2_w'].reshape(1, L),                    # row vector
        'bfc2': params['fc2_b'].reshape(1, 1),
    }
    if conditioning:
        W1 = params['fc1_cond_w']                                 # (L, H+1)
        prepped['wfc1h'] = W1[:, :H].T                            # (H, L)
        prepped['wfc1r'] = W1[:, H:].T                            # (1, L)
        prepped['bfc1'] = params['fc1_cond_b'].reshape(1, L)
    else:
        prepped['wfc1h'] = params['fc1_uncond_w'].T               # (H, L)
        prepped['wfc1r'] = jnp.zeros((1, L), jnp.float32)
        prepped['bfc1'] = params['fc1_uncond_b'].reshape(1, L)
    return prepped


def model1_forward(prepped, X, r, conditioning):
    """X: (B, T, F) batch_first like PyTorch; r: (B, T, 1). Returns (B, 1)."""
    B, T, F = X.shape
    H = prepped['hidden_size']

    # time-major + flatten so the layer-0 projection is one matmul in-kernel
    x2d = jnp.transpose(X, (1, 0, 2)).reshape(T * B, F).astype(jnp.float32)
    r_last = r[:, -1, :].astype(jnp.float32)                      # (B, 1)

    kernel = functools.partial(lstm_mlp_kernel, hidden_size=H,
                               conditioning=conditioning, seq_len=T, batch=B)
    vmem = pl.BlockSpec(memory_space=pltpu.MemorySpace.VMEM)
    return pl.pallas_call(
        kernel,
        out_shape=jax.ShapeDtypeStruct((B, 1), jnp.float32),
        in_specs=[vmem] * 13,
        out_specs=vmem,
    )(x2d, r_last,
      prepped['wih0'], prepped['whh0'], prepped['b0'],
      prepped['wih1'], prepped['whh1'], prepped['b1'],
      prepped['wfc1h'], prepped['wfc1r'], prepped['bfc1'],
      prepped['wfc2'], prepped['bfc2'])


def init_params(key, input_size, hidden_size, linear_width):
    """Deterministic init mirroring PyTorch reset_parameters U(-1/sqrt(fan), ...)."""
    ks = jax.random.split(key, 14)
    kH = 1.0 / math.sqrt(hidden_size)
    kC = 1.0 / math.sqrt(hidden_size + 1)
    kL = 1.0 / math.sqrt(linear_width)

    def u(k, shape, bound):
        return jax.random.uniform(k, shape, jnp.float32, -bound, bound)

    return {
        'hidden_size': hidden_size,
        'linear_width': linear_width,
        'w_ih_l0': u(ks[0], (4 * hidden_size, input_size), kH),
        'w_hh_l0': u(ks[1], (4 * hidden_size, hidden_size), kH),
        'b_ih_l0': u(ks[2], (4 * hidden_size,), kH),
        'b_hh_l0': u(ks[3], (4 * hidden_size,), kH),
        'w_ih_l1': u(ks[4], (4 * hidden_size, hidden_size), kH),
        'w_hh_l1': u(ks[5], (4 * hidden_size, hidden_size), kH),
        'b_ih_l1': u(ks[6], (4 * hidden_size,), kH),
        'b_hh_l1': u(ks[7], (4 * hidden_size,), kH),
        'fc1_cond_w': u(ks[8], (linear_width, hidden_size + 1), kC),
        'fc1_cond_b': u(ks[9], (linear_width,), kC),
        'fc1_uncond_w': u(ks[10], (linear_width, hidden_size), kH),
        'fc1_uncond_b': u(ks[11], (linear_width,), kH),
        'fc2_w': u(ks[12], (1, linear_width), kL),
        'fc2_b': u(ks[13], (1,), kL),
    }


def reference_forward(params, X, r, conditioning):
    """Pure-JAX reference of Model1.forward (for correctness check)."""
    H = params['hidden_size']
    lrelu = lambda v: jnp.where(v >= 0, v, NEG_SLOPE * v)

    def lstm_layer(x_seq, wih, whh, b):
        B = x_seq.shape[1]

        def step(carry, x_t):
            h, c = carry
            g = x_t @ wih.T + h @ whh.T + b
            i = jax.nn.sigmoid(g[:, :H])
            f = jax.nn.sigmoid(g[:, H:2 * H])
            gg = jnp.tanh(g[:, 2 * H:3 * H])
            o = jax.nn.sigmoid(g[:, 3 * H:])
            c = f * c + i * gg
            h = o * jnp.tanh(c)
            return (h, c), h

        z = jnp.zeros((B, H), jnp.float32)
        (h, _), hs = lax.scan(step, (z, z), x_seq)
        return hs, h

    x_tbf = jnp.transpose(X, (1, 0, 2))
    hs0, _ = lstm_layer(x_tbf, params['w_ih_l0'], params['w_hh_l0'],
                        params['b_ih_l0'] + params['b_hh_l0'])
    _, h1 = lstm_layer(hs0, params['w_ih_l1'], params['w_hh_l1'],
                       params['b_ih_l1'] + params['b_hh_l1'])
    if conditioning:
        hn = jnp.concatenate([h1, r[:, -1, :]], axis=1)
        out = lrelu(hn) @ params['fc1_cond_w'].T + params['fc1_cond_b']
    else:
        out = lrelu(h1) @ params['fc1_uncond_w'].T + params['fc1_uncond_b']
    out = lrelu(out)
    return out @ params['fc2_w'].T + params['fc2_b']


if __name__ == "__main__":
    B, T, F, H, L = 4, 8, 4, 32, 256  # batch, seq, input_size, hidden, linear_width
    key = jax.random.PRNGKey(0)
    kx, kr, kp = jax.random.split(key, 3)

    X = jax.random.normal(kx, (B, T, F), jnp.float32)
    r = jax.random.normal(kr, (B, T, 1), jnp.float32)
    params = init_params(kp, F, H, L)

    # conditioned branch
    prepped_c = prepare_params(params, conditioning=True)
    out = jax.block_until_ready(model1_forward(prepped_c, X, r, conditioning=True))
    assert out.shape == (B, 1), out.shape
    ref = reference_forward(params, X, r, conditioning=True)
    assert jnp.allclose(out, ref, atol=5e-5, rtol=1e-5), (out, ref)

    # unconditioned branch
    prepped_u = prepare_params(params, conditioning=False)
    out_u = jax.block_until_ready(model1_forward(prepped_u, X, r, conditioning=False))
    ref_u = reference_forward(params, X, r, conditioning=False)
    assert jnp.allclose(out_u, ref_u, atol=5e-5, rtol=1e-5), (out_u, ref_u)

    print("KERNEL_OK")
</pallas_src>

<mosaic_0001>
module attributes {stable_mosaic.version = 11 : i64} {
  func.func @lstm_mlp_kernel(%arg0: memref<32x4xf32, #tpu.memory_space<vmem>>, %arg1: memref<4x1xf32, #tpu.memory_space<vmem>>, %arg2: memref<4x128xf32, #tpu.memory_space<vmem>>, %arg3: memref<32x128xf32, #tpu.memory_space<vmem>>, %arg4: memref<1x128xf32, #tpu.memory_space<vmem>>, %arg5: memref<32x128xf32, #tpu.memory_space<vmem>>, %arg6: memref<32x128xf32, #tpu.memory_space<vmem>>, %arg7: memref<1x128xf32, #tpu.memory_space<vmem>>, %arg8: memref<32x256xf32, #tpu.memory_space<vmem>>, %arg9: memref<1x256xf32, #tpu.memory_space<vmem>>, %arg10: memref<1x256xf32, #tpu.memory_space<vmem>>, %arg11: memref<1x256xf32, #tpu.memory_space<vmem>>, %arg12: memref<1x1xf32, #tpu.memory_space<vmem>>, %arg13: memref<4x1xf32, #tpu.memory_space<vmem>>) attributes {dimension_semantics = [], scalar_prefetch = 0 : i64, scratch_operands = 0 : i64, tpu.core_type = #tpu.core_type<tc>} {
    %c0 = arith.constant 0 : index
    %c0_0 = arith.constant 0 : index
    %0 = vector.load %arg3[%c0, %c0_0] : memref<32x128xf32, #tpu.memory_space<vmem>>, vector<32x128xf32>
    %c0_1 = arith.constant 0 : index
    %c0_2 = arith.constant 0 : index
    %1 = vector.load %arg5[%c0_1, %c0_2] : memref<32x128xf32, #tpu.memory_space<vmem>>, vector<32x128xf32>
    %c0_3 = arith.constant 0 : index
    %c0_4 = arith.constant 0 : index
    %2 = vector.load %arg6[%c0_3, %c0_4] : memref<32x128xf32, #tpu.memory_space<vmem>>, vector<32x128xf32>
    %c0_5 = arith.constant 0 : index
    %c0_6 = arith.constant 0 : index
    %3 = vector.load %arg7[%c0_5, %c0_6] : memref<1x128xf32, #tpu.memory_space<vmem>>, vector<1x128xf32>
    %c0_7 = arith.constant 0 : index
    %c0_8 = arith.constant 0 : index
    %4 = vector.load %arg0[%c0_7, %c0_8] : memref<32x4xf32, #tpu.memory_space<vmem>>, vector<32x4xf32>
    %c0_9 = arith.constant 0 : index
    %c0_10 = arith.constant 0 : index
    %5 = vector.load %arg2[%c0_9, %c0_10] : memref<4x128xf32, #tpu.memory_space<vmem>>, vector<4x128xf32>
    %cst = arith.constant dense<0.000000e+00> : vector<32x128xf32>
    %6 = tpu.matmul %4, %5, %cst {dimension_numbers = #tpu.dot_dimension_numbers<[1], [0], [0], [1], [0, 0, 1, 1], [], []>} : vector<32x4xf32>, vector<4x128xf32>, vector<32x128xf32> -> vector<32x128xf32>
    %c0_11 = arith.constant 0 : index
    %c0_12 = arith.constant 0 : index
    %7 = vector.load %arg4[%c0_11, %c0_12] : memref<1x128xf32, #tpu.memory_space<vmem>>, vector<1x128xf32>
    %8 = vector.broadcast %7 : vector<1x128xf32> to vector<32x128xf32>
    %9 = arith.addf %6, %8 : vector<32x128xf32>
    %cst_13 = arith.constant 0.000000e+00 : f32
    %10 = vector.broadcast %cst_13 : f32 to vector<4x32xf32>
    %11 = vector.extract_strided_slice %9 {offsets = [0, 0], sizes = [4, 128], strides = [1, 1]} : vector<32x128xf32> to vector<4x128xf32>
    %cst_14 = arith.constant dense<0.000000e+00> : vector<4x128xf32>
    %12 = tpu.matmul %10, %0, %cst_14 {dimension_numbers = #tpu.dot_dimension_numbers<[1], [0], [0], [1], [0, 0, 1, 1], [], []>} : vector<4x32xf32>, vector<32x128xf32>, vector<4x128xf32> -> vector<4x128xf32>
    %13 = arith.addf %11, %12 : vector<4x128xf32>
    %14 = arith.negf %13 : vector<4x128xf32>
    %15 = math.exp %14 : vector<4x128xf32>
    %cst_15 = arith.constant 1.000000e+00 : f32
    %16 = vector.broadcast %cst_15 : f32 to vector<4x128xf32>
    %17 = arith.addf %16, %15 : vector<4x128xf32>
    %18 = arith.divf %16, %17 : vector<4x128xf32>
    %19 = math.tanh %13 : vector<4x128xf32>
    %20 = vector.extract_strided_slice %18 {offsets = [0, 0], sizes = [4, 32], strides = [1, 1]} : vector<4x128xf32> to vector<4x32xf32>
    %21 = vector.extract_strided_slice %18 {offsets = [0, 32], sizes = [4, 32], strides = [1, 1]} : vector<4x128xf32> to vector<4x32xf32>
    %22 = vector.extract_strided_slice %19 {offsets = [0, 64], sizes = [4, 32], strides = [1, 1]} : vector<4x128xf32> to vector<4x32xf32>
    %23 = vector.extract_strided_slice %18 {offsets = [0, 96], sizes = [4, 32], strides = [1, 1]} : vector<4x128xf32> to vector<4x32xf32>
    %24 = arith.mulf %21, %10 : vector<4x32xf32>
    %25 = arith.mulf %20, %22 : vector<4x32xf32>
    %26 = arith.addf %24, %25 : vector<4x32xf32>
    %27 = math.tanh %26 : vector<4x32xf32>
    %28 = arith.mulf %23, %27 : vector<4x32xf32>
    %cst_16 = arith.constant dense<0.000000e+00> : vector<4x128xf32>
    %29 = tpu.matmul %28, %1, %cst_16 {dimension_numbers = #tpu.dot_dimension_numbers<[1], [0], [0], [1], [0, 0, 1, 1], [], []>} : vector<4x32xf32>, vector<32x128xf32>, vector<4x128xf32> -> vector<4x128xf32>
    %30 = vector.broadcast %3 : vector<1x128xf32> to vector<4x128xf32>
    %31 = arith.addf %29, %30 : vector<4x128xf32>
    %cst_17 = arith.constant dense<0.000000e+00> : vector<4x128xf32>
    %32 = tpu.matmul %10, %2, %cst_17 {dimension_numbers = #tpu.dot_dimension_numbers<[1], [0], [0], [1], [0, 0, 1, 1], [], []>} : vector<4x32xf32>, vector<32x128xf32>, vector<4x128xf32> -> vector<4x128xf32>
    %33 = arith.addf %31, %32 : vector<4x128xf32>
    %34 = arith.negf %33 : vector<4x128xf32>
    %35 = math.exp %34 : vector<4x128xf32>
    %cst_18 = arith.constant 1.000000e+00 : f32
    %36 = vector.broadcast %cst_18 : f32 to vector<4x128xf32>
    %37 = arith.addf %36, %35 : vector<4x128xf32>
    %38 = arith.divf %36, %37 : vector<4x128xf32>
    %39 = math.tanh %33 : vector<4x128xf32>
    %40 = vector.extract_strided_slice %38 {offsets = [0, 0], sizes = [4, 32], strides = [1, 1]} : vector<4x128xf32> to vector<4x32xf32>
    %41 = vector.extract_strided_slice %38 {offsets = [0, 32], sizes = [4, 32], strides = [1, 1]} : vector<4x128xf32> to vector<4x32xf32>
    %42 = vector.extract_strided_slice %39 {offsets = [0, 64], sizes = [4, 32], strides = [1, 1]} : vector<4x128xf32> to vector<4x32xf32>
    %43 = vector.extract_strided_slice %38 {offsets = [0, 96], sizes = [4, 32], strides = [1, 1]} : vector<4x128xf32> to vector<4x32xf32>
    %44 = arith.mulf %41, %10 : vector<4x32xf32>
    %45 = arith.mulf %40, %42 : vector<4x32xf32>
    %46 = arith.addf %44, %45 : vector<4x32xf32>
    %47 = math.tanh %46 : vector<4x32xf32>
    %48 = arith.mulf %43, %47 : vector<4x32xf32>
    %49 = vector.extract_strided_slice %9 {offsets = [4, 0], sizes = [4, 128], strides = [1, 1]} : vector<32x128xf32> to vector<4x128xf32>
    %cst_19 = arith.constant dense<0.000000e+00> : vector<4x128xf32>
    %50 = tpu.matmul %28, %0, %cst_19 {dimension_numbers = #tpu.dot_dimension_numbers<[1], [0], [0], [1], [0, 0, 1, 1], [], []>} : vector<4x32xf32>, vector<32x128xf32>, vector<4x128xf32> -> vector<4x128xf32>
    %51 = arith.addf %49, %50 : vector<4x128xf32>
    %52 = arith.negf %51 : vector<4x128xf32>
    %53 = math.exp %52 : vector<4x128xf32>
    %cst_20 = arith.constant 1.000000e+00 : f32
    %54 = vector.broadcast %cst_20 : f32 to vector<4x128xf32>
    %55 = arith.addf %54, %53 : vector<4x128xf32>
    %56 = arith.divf %54, %55 : vector<4x128xf32>
    %57 = math.tanh %51 : vector<4x128xf32>
    %58 = vector.extract_strided_slice %56 {offsets = [0, 0], sizes = [4, 32], strides = [1, 1]} : vector<4x128xf32> to vector<4x32xf32>
    %59 = vector.extract_strided_slice %56 {offsets = [0, 32], sizes = [4, 32], strides = [1, 1]} : vector<4x128xf32> to vector<4x32xf32>
    %60 = vector.extract_strided_slice %57 {offsets = [0, 64], sizes = [4, 32], strides = [1, 1]} : vector<4x128xf32> to vector<4x32xf32>
    %61 = vector.extract_strided_slice %56 {offsets = [0, 96], sizes = [4, 32], strides = [1, 1]} : vector<4x128xf32> to vector<4x32xf32>
    %62 = arith.mulf %59, %26 : vector<4x32xf32>
    %63 = arith.mulf %58, %60 : vector<4x32xf32>
    %64 = arith.addf %62, %63 : vector<4x32xf32>
    %65 = math.tanh %64 : vector<4x32xf32>
    %66 = arith.mulf %61, %65 : vector<4x32xf32>
    %cst_21 = arith.constant dense<0.000000e+00> : vector<4x128xf32>
    %67 = tpu.matmul %66, %1, %cst_21 {dimension_numbers = #tpu.dot_dimension_numbers<[1], [0], [0], [1], [0, 0, 1, 1], [], []>} : vector<4x32xf32>, vector<32x128xf32>, vector<4x128xf32> -> vector<4x128xf32>
    %68 = vector.broadcast %3 : vector<1x128xf32> to vector<4x128xf32>
    %69 = arith.addf %67, %68 : vector<4x128xf32>
    %cst_22 = arith.constant dense<0.000000e+00> : vector<4x128xf32>
    %70 = tpu.matmul %48, %2, %cst_22 {dimension_numbers = #tpu.dot_dimension_numbers<[1], [0], [0], [1], [0, 0, 1, 1], [], []>} : vector<4x32xf32>, vector<32x128xf32>, vector<4x128xf32> -> vector<4x128xf32>
    %71 = arith.addf %69, %70 : vector<4x128xf32>
    %72 = arith.negf %71 : vector<4x128xf32>
    %73 = math.exp %72 : vector<4x128xf32>
    %cst_23 = arith.constant 1.000000e+00 : f32
    %74 = vector.broadcast %cst_23 : f32 to vector<4x128xf32>
    %75 = arith.addf %74, %73 : vector<4x128xf32>
    %76 = arith.divf %74, %75 : vector<4x128xf32>
    %77 = math.tanh %71 : vector<4x128xf32>
    %78 = vector.extract_strided_slice %76 {offsets = [0, 0], sizes = [4, 32], strides = [1, 1]} : vector<4x128xf32> to vector<4x32xf32>
    %79 = vector.extract_strided_slice %76 {offsets = [0, 32], sizes = [4, 32], strides = [1, 1]} : vector<4x128xf32> to vector<4x32xf32>
    %80 = vector.extract_strided_slice %77 {offsets = [0, 64], sizes = [4, 32], strides = [1, 1]} : vector<4x128xf32> to vector<4x32xf32>
    %81 = vector.extract_strided_slice %76 {offsets = [0, 96], sizes = [4, 32], strides = [1, 1]} : vector<4x128xf32> to vector<4x32xf32>
    %82 = arith.mulf %79, %46 : vector<4x32xf32>
    %83 = arith.mulf %78, %80 : vector<4x32xf32>
    %84 = arith.addf %82, %83 : vector<4x32xf32>
    %85 = math.tanh %84 : vector<4x32xf32>
    %86 = arith.mulf %81, %85 : vector<4x32xf32>
    %87 = vector.extract_strided_slice %9 {offsets = [8, 0], sizes = [4, 128], strides = [1, 1]} : vector<32x128xf32> to vector<4x128xf32>
    %cst_24 = arith.constant dense<0.000000e+00> : vector<4x128xf32>
    %88 = tpu.matmul %66, %0, %cst_24 {dimension_numbers = #tpu.dot_dimension_numbers<[1], [0], [0], [1], [0, 0, 1, 1], [], []>} : vector<4x32xf32>, vector<32x128xf32>, vector<4x128xf32> -> vector<4x128xf32>
    %89 = arith.addf %87, %88 : vector<4x128xf32>
    %90 = arith.negf %89 : vector<4x128xf32>
    %91 = math.exp %90 : vector<4x128xf32>
    %cst_25 = arith.constant 1.000000e+00 : f32
    %92 = vector.broadcast %cst_25 : f32 to vector<4x128xf32>
    %93 = arith.addf %92, %91 : vector<4x128xf32>
    %94 = arith.divf %92, %93 : vector<4x128xf32>
    %95 = math.tanh %89 : vector<4x128xf32>
    %96 = vector.extract_strided_slice %94 {offsets = [0, 0], sizes = [4, 32], strides = [1, 1]} : vector<4x128xf32> to vector<4x32xf32>
    %97 = vector.extract_strided_slice %94 {offsets = [0, 32], sizes = [4, 32], strides = [1, 1]} : vector<4x128xf32> to vector<4x32xf32>
    %98 = vector.extract_strided_slice %95 {offsets = [0, 64], sizes = [4, 32], strides = [1, 1]} : vector<4x128xf32> to vector<4x32xf32>
    %99 = vector.extract_strided_slice %94 {offsets = [0, 96], sizes = [4, 32], strides = [1, 1]} : vector<4x128xf32> to vector<4x32xf32>
    %100 = arith.mulf %97, %64 : vector<4x32xf32>
    %101 = arith.mulf %96, %98 : vector<4x32xf32>
    %102 = arith.addf %100, %101 : vector<4x32xf32>
    %103 = math.tanh %102 : vector<4x32xf32>
    %104 = arith.mulf %99, %103 : vector<4x32xf32>
    %cst_26 = arith.constant dense<0.000000e+00> : vector<4x128xf32>
    %105 = tpu.matmul %104, %1, %cst_26 {dimension_numbers = #tpu.dot_dimension_numbers<[1], [0], [0], [1], [0, 0, 1, 1], [], []>} : vector<4x32xf32>, vector<32x128xf32>, vector<4x128xf32> -> vector<4x128xf32>
    %106 = vector.broadcast %3 : vector<1x128xf32> to vector<4x128xf32>
    %107 = arith.addf %105, %106 : vector<4x128xf32>
    %cst_27 = arith.constant dense<0.000000e+00> : vector<4x128xf32>
    %108 = tpu.matmul %86, %2, %cst_27 {dimension_numbers = #tpu.dot_dimension_numbers<[1], [0], [0], [1], [0, 0, 1, 1], [], []>} : vector<4x32xf32>, vector<32x128xf32>, vector<4x128xf32> -> vector<4x128xf32>
    %109 = arith.addf %107, %108 : vector<4x128xf32>
    %110 = arith.negf %109 : vector<4x128xf32>
    %111 = math.exp %110 : vector<4x128xf32>
    %cst_28 = arith.constant 1.000000e+00 : f32
    %112 = vector.broadcast %cst_28 : f32 to vector<4x128xf32>
    %113 = arith.addf %112, %111 : vector<4x128xf32>
    %114 = arith.divf %112, %113 : vector<4x128xf32>
    %115 = math.tanh %109 : vector<4x128xf32>
    %116 = vector.extract_strided_slice %114 {offsets = [0, 0], sizes = [4, 32], strides = [1, 1]} : vector<4x128xf32> to vector<4x32xf32>
    %117 = vector.extract_strided_slice %114 {offsets = [0, 32], sizes = [4, 32], strides = [1, 1]} : vector<4x128xf32> to vector<4x32xf32>
    %118 = vector.extract_strided_slice %115 {offsets = [0, 64], sizes = [4, 32], strides = [1, 1]} : vector<4x128xf32> to vector<4x32xf32>
    %119 = vector.extract_strided_slice %114 {offsets = [0, 96], sizes = [4, 32], strides = [1, 1]} : vector<4x128xf32> to vector<4x32xf32>
    %120 = arith.mulf %117, %84 : vector<4x32xf32>
    %121 = arith.mulf %116, %118 : vector<4x32xf32>
    %122 = arith.addf %120, %121 : vector<4x32xf32>
    %123 = math.tanh %122 : vector<4x32xf32>
    %124 = arith.mulf %119, %123 : vector<4x32xf32>
    %125 = vector.extract_strided_slice %9 {offsets = [12, 0], sizes = [4, 128], strides = [1, 1]} : vector<32x128xf32> to vector<4x128xf32>
    %cst_29 = arith.constant dense<0.000000e+00> : vector<4x128xf32>
    %126 = tpu.matmul %104, %0, %cst_29 {dimension_numbers = #tpu.dot_dimension_numbers<[1], [0], [0], [1], [0, 0, 1, 1], [], []>} : vector<4x32xf32>, vector<32x128xf32>, vector<4x128xf32> -> vector<4x128xf32>
    %127 = arith.addf %125, %126 : vector<4x128xf32>
    %128 = arith.negf %127 : vector<4x128xf32>
    %129 = math.exp %128 : vector<4x128xf32>
    %cst_30 = arith.constant 1.000000e+00 : f32
    %130 = vector.broadcast %cst_30 : f32 to vector<4x128xf32>
    %131 = arith.addf %130, %129 : vector<4x128xf32>
    %132 = arith.divf %130, %131 : vector<4x128xf32>
    %133 = math.tanh %127 : vector<4x128xf32>
    %134 = vector.extract_strided_slice %132 {offsets = [0, 0], sizes = [4, 32], strides = [1, 1]} : vector<4x128xf32> to vector<4x32xf32>
    %135 = vector.extract_strided_slice %132 {offsets = [0, 32], sizes = [4, 32], strides = [1, 1]} : vector<4x128xf32> to vector<4x32xf32>
    %136 = vector.extract_strided_slice %133 {offsets = [0, 64], sizes = [4, 32], strides = [1, 1]} : vector<4x128xf32> to vector<4x32xf32>
    %137 = vector.extract_strided_slice %132 {offsets = [0, 96], sizes = [4, 32], strides = [1, 1]} : vector<4x128xf32> to vector<4x32xf32>
    %138 = arith.mulf %135, %102 : vector<4x32xf32>
    %139 = arith.mulf %134, %136 : vector<4x32xf32>
    %140 = arith.addf %138, %139 : vector<4x32xf32>
    %141 = math.tanh %140 : vector<4x32xf32>
    %142 = arith.mulf %137, %141 : vector<4x32xf32>
    %cst_31 = arith.constant dense<0.000000e+00> : vector<4x128xf32>
    %143 = tpu.matmul %142, %1, %cst_31 {dimension_numbers = #tpu.dot_dimension_numbers<[1], [0], [0], [1], [0, 0, 1, 1], [], []>} : vector<4x32xf32>, vector<32x128xf32>, vector<4x128xf32> -> vector<4x128xf32>
    %144 = vector.broadcast %3 : vector<1x128xf32> to vector<4x128xf32>
    %145 = arith.addf %143, %144 : vector<4x128xf32>
    %cst_32 = arith.constant dense<0.000000e+00> : vector<4x128xf32>
    %146 = tpu.matmul %124, %2, %cst_32 {dimension_numbers = #tpu.dot_dimension_numbers<[1], [0], [0], [1], [0, 0, 1, 1], [], []>} : vector<4x32xf32>, vector<32x128xf32>, vector<4x128xf32> -> vector<4x128xf32>
    %147 = arith.addf %145, %146 : vector<4x128xf32>
    %148 = arith.negf %147 : vector<4x128xf32>
    %149 = math.exp %148 : vector<4x128xf32>
    %cst_33 = arith.constant 1.000000e+00 : f32
    %150 = vector.broadcast %cst_33 : f32 to vector<4x128xf32>
    %151 = arith.addf %150, %149 : vector<4x128xf32>
    %152 = arith.divf %150, %151 : vector<4x128xf32>
    %153 = math.tanh %147 : vector<4x128xf32>
    %154 = vector.extract_strided_slice %152 {offsets = [0, 0], sizes = [4, 32], strides = [1, 1]} : vector<4x128xf32> to vector<4x32xf32>
    %155 = vector.extract_strided_slice %152 {offsets = [0, 32], sizes = [4, 32], strides = [1, 1]} : vector<4x128xf32> to vector<4x32xf32>
    %156 = vector.extract_strided_slice %153 {offsets = [0, 64], sizes = [4, 32], strides = [1, 1]} : vector<4x128xf32> to vector<4x32xf32>
    %157 = vector.extract_strided_slice %152 {offsets = [0, 96], sizes = [4, 32], strides = [1, 1]} : vector<4x128xf32> to vector<4x32xf32>
    %158 = arith.mulf %155, %122 : vector<4x32xf32>
    %159 = arith.mulf %154, %156 : vector<4x32xf32>
    %160 = arith.addf %158, %159 : vector<4x32xf32>
    %161 = math.tanh %160 : vector<4x32xf32>
    %162 = arith.mulf %157, %161 : vector<4x32xf32>
    %163 = vector.extract_strided_slice %9 {offsets = [16, 0], sizes = [4, 128], strides = [1, 1]} : vector<32x128xf32> to vector<4x128xf32>
    %cst_34 = arith.constant dense<0.000000e+00> : vector<4x128xf32>
    %164 = tpu.matmul %142, %0, %cst_34 {dimension_numbers = #tpu.dot_dimension_numbers<[1], [0], [0], [1], [0, 0, 1, 1], [], []>} : vector<4x32xf32>, vector<32x128xf32>, vector<4x128xf32> -> vector<4x128xf32>
    %165 = arith.addf %163, %164 : vector<4x128xf32>
    %166 = arith.negf %165 : vector<4x128xf32>
    %167 = math.exp %166 : vector<4x128xf32>
    %cst_35 = arith.constant 1.000000e+00 : f32
    %168 = vector.broadcast %cst_35 : f32 to vector<4x128xf32>
    %169 = arith.addf %168, %167 : vector<4x128xf32>
    %170 = arith.divf %168, %169 : vector<4x128xf32>
    %171 = math.tanh %165 : vector<4x128xf32>
    %172 = vector.extract_strided_slice %170 {offsets = [0, 0], sizes = [4, 32], strides = [1, 1]} : vector<4x128xf32> to vector<4x32xf32>
    %173 = vector.extract_strided_slice %170 {offsets = [0, 32], sizes = [4, 32], strides = [1, 1]} : vector<4x128xf32> to vector<4x32xf32>
    %174 = vector.extract_strided_slice %171 {offsets = [0, 64], sizes = [4, 32], strides = [1, 1]} : vector<4x128xf32> to vector<4x32xf32>
    %175 = vector.extract_strided_slice %170 {offsets = [0, 96], sizes = [4, 32], strides = [1, 1]} : vector<4x128xf32> to vector<4x32xf32>
    %176 = arith.mulf %173, %140 : vector<4x32xf32>
    %177 = arith.mulf %172, %174 : vector<4x32xf32>
    %178 = arith.addf %176, %177 : vector<4x32xf32>
    %179 = math.tanh %178 : vector<4x32xf32>
    %180 = arith.mulf %175, %179 : vector<4x32xf32>
    %cst_36 = arith.constant dense<0.000000e+00> : vector<4x128xf32>
    %181 = tpu.matmul %180, %1, %cst_36 {dimension_numbers = #tpu.dot_dimension_numbers<[1], [0], [0], [1], [0, 0, 1, 1], [], []>} : vector<4x32xf32>, vector<32x128xf32>, vector<4x128xf32> -> vector<4x128xf32>
    %182 = vector.broadcast %3 : vector<1x128xf32> to vector<4x128xf32>
    %183 = arith.addf %181, %182 : vector<4x128xf32>
    %cst_37 = arith.constant dense<0.000000e+00> : vector<4x128xf32>
    %184 = tpu.matmul %162, %2, %cst_37 {dimension_numbers = #tpu.dot_dimension_numbers<[1], [0], [0], [1], [0, 0, 1, 1], [], []>} : vector<4x32xf32>, vector<32x128xf32>, vector<4x128xf32> -> vector<4x128xf32>
    %185 = arith.addf %183, %184 : vector<4x128xf32>
    %186 = arith.negf %185 : vector<4x128xf32>
    %187 = math.exp %186 : vector<4x128xf32>
    %cst_38 = arith.constant 1.000000e+00 : f32
    %188 = vector.broadcast %cst_38 : f32 to vector<4x128xf32>
    %189 = arith.addf %188, %187 : vector<4x128xf32>
    %190 = arith.divf %188, %189 : vector<4x128xf32>
    %191 = math.tanh %185 : vector<4x128xf32>
    %192 = vector.extract_strided_slice %190 {offsets = [0, 0], sizes = [4, 32], strides = [1, 1]} : vector<4x128xf32> to vector<4x32xf32>
    %193 = vector.extract_strided_slice %190 {offsets = [0, 32], sizes = [4, 32], strides = [1, 1]} : vector<4x128xf32> to vector<4x32xf32>
    %194 = vector.extract_strided_slice %191 {offsets = [0, 64], sizes = [4, 32], strides = [1, 1]} : vector<4x128xf32> to vector<4x32xf32>
    %195 = vector.extract_strided_slice %190 {offsets = [0, 96], sizes = [4, 32], strides = [1, 1]} : vector<4x128xf32> to vector<4x32xf32>
    %196 = arith.mulf %193, %160 : vector<4x32xf32>
    %197 = arith.mulf %192, %194 : vector<4x32xf32>
    %198 = arith.addf %196, %197 : vector<4x32xf32>
    %199 = math.tanh %198 : vector<4x32xf32>
    %200 = arith.mulf %195, %199 : vector<4x32xf32>
    %201 = vector.extract_strided_slice %9 {offsets = [20, 0], sizes = [4, 128], strides = [1, 1]} : vector<32x128xf32> to vector<4x128xf32>
    %cst_39 = arith.constant dense<0.000000e+00> : vector<4x128xf32>
    %202 = tpu.matmul %180, %0, %cst_39 {dimension_numbers = #tpu.dot_dimension_numbers<[1], [0], [0], [1], [0, 0, 1, 1], [], []>} : vector<4x32xf32>, vector<32x128xf32>, vector<4x128xf32> -> vector<4x128xf32>
    %203 = arith.addf %201, %202 : vector<4x128xf32>
    %204 = arith.negf %203 : vector<4x128xf32>
    %205 = math.exp %204 : vector<4x128xf32>
    %cst_40 = arith.constant 1.000000e+00 : f32
    %206 = vector.broadcast %cst_40 : f32 to vector<4x128xf32>
    %207 = arith.addf %206, %205 : vector<4x128xf32>
    %208 = arith.divf %206, %207 : vector<4x128xf32>
    %209 = math.tanh %203 : vector<4x128xf32>
    %210 = vector.extract_strided_slice %208 {offsets = [0, 0], sizes = [4, 32], strides = [1, 1]} : vector<4x128xf32> to vector<4x32xf32>
    %211 = vector.extract_strided_slice %208 {offsets = [0, 32], sizes = [4, 32], strides = [1, 1]} : vector<4x128xf32> to vector<4x32xf32>
    %212 = vector.extract_strided_slice %209 {offsets = [0, 64], sizes = [4, 32], strides = [1, 1]} : vector<4x128xf32> to vector<4x32xf32>
    %213 = vector.extract_strided_slice %208 {offsets = [0, 96], sizes = [4, 32], strides = [1, 1]} : vector<4x128xf32> to vector<4x32xf32>
    %214 = arith.mulf %211, %178 : vector<4x32xf32>
    %215 = arith.mulf %210, %212 : vector<4x32xf32>
    %216 = arith.addf %214, %215 : vector<4x32xf32>
    %217 = math.tanh %216 : vector<4x32xf32>
    %218 = arith.mulf %213, %217 : vector<4x32xf32>
    %cst_41 = arith.constant dense<0.000000e+00> : vector<4x128xf32>
    %219 = tpu.matmul %218, %1, %cst_41 {dimension_numbers = #tpu.dot_dimension_numbers<[1], [0], [0], [1], [0, 0, 1, 1], [], []>} : vector<4x32xf32>, vector<32x128xf32>, vector<4x128xf32> -> vector<4x128xf32>
    %220 = vector.broadcast %3 : vector<1x128xf32> to vector<4x128xf32>
    %221 = arith.addf %219, %220 : vector<4x128xf32>
    %cst_42 = arith.constant dense<0.000000e+00> : vector<4x128xf32>
    %222 = tpu.matmul %200, %2, %cst_42 {dimension_numbers = #tpu.dot_dimension_numbers<[1], [0], [0], [1], [0, 0, 1, 1], [], []>} : vector<4x32xf32>, vector<32x128xf32>, vector<4x128xf32> -> vector<4x128xf32>
    %223 = arith.addf %221, %222 : vector<4x128xf32>
    %224 = arith.negf %223 : vector<4x128xf32>
    %225 = math.exp %224 : vector<4x128xf32>
    %cst_43 = arith.constant 1.000000e+00 : f32
    %226 = vector.broadcast %cst_43 : f32 to vector<4x128xf32>
    %227 = arith.addf %226, %225 : vector<4x128xf32>
    %228 = arith.divf %226, %227 : vector<4x128xf32>
    %229 = math.tanh %223 : vector<4x128xf32>
    %230 = vector.extract_strided_slice %228 {offsets = [0, 0], sizes = [4, 32], strides = [1, 1]} : vector<4x128xf32> to vector<4x32xf32>
    %231 = vector.extract_strided_slice %228 {offsets = [0, 32], sizes = [4, 32], strides = [1, 1]} : vector<4x128xf32> to vector<4x32xf32>
    %232 = vector.extract_strided_slice %229 {offsets = [0, 64], sizes = [4, 32], strides = [1, 1]} : vector<4x128xf32> to vector<4x32xf32>
    %233 = vector.extract_strided_slice %228 {offsets = [0, 96], sizes = [4, 32], strides = [1, 1]} : vector<4x128xf32> to vector<4x32xf32>
    %234 = arith.mulf %231, %198 : vector<4x32xf32>
    %235 = arith.mulf %230, %232 : vector<4x32xf32>
    %236 = arith.addf %234, %235 : vector<4x32xf32>
    %237 = math.tanh %236 : vector<4x32xf32>
    %238 = arith.mulf %233, %237 : vector<4x32xf32>
    %239 = vector.extract_strided_slice %9 {offsets = [24, 0], sizes = [4, 128], strides = [1, 1]} : vector<32x128xf32> to vector<4x128xf32>
    %cst_44 = arith.constant dense<0.000000e+00> : vector<4x128xf32>
    %240 = tpu.matmul %218, %0, %cst_44 {dimension_numbers = #tpu.dot_dimension_numbers<[1], [0], [0], [1], [0, 0, 1, 1], [], []>} : vector<4x32xf32>, vector<32x128xf32>, vector<4x128xf32> -> vector<4x128xf32>
    %241 = arith.addf %239, %240 : vector<4x128xf32>
    %242 = arith.negf %241 : vector<4x128xf32>
    %243 = math.exp %242 : vector<4x128xf32>
    %cst_45 = arith.constant 1.000000e+00 : f32
    %244 = vector.broadcast %cst_45 : f32 to vector<4x128xf32>
    %245 = arith.addf %244, %243 : vector<4x128xf32>
    %246 = arith.divf %244, %245 : vector<4x128xf32>
    %247 = math.tanh %241 : vector<4x128xf32>
    %248 = vector.extract_strided_slice %246 {offsets = [0, 0], sizes = [4, 32], strides = [1, 1]} : vector<4x128xf32> to vector<4x32xf32>
    %249 = vector.extract_strided_slice %246 {offsets = [0, 32], sizes = [4, 32], strides = [1, 1]} : vector<4x128xf32> to vector<4x32xf32>
    %250 = vector.extract_strided_slice %247 {offsets = [0, 64], sizes = [4, 32], strides = [1, 1]} : vector<4x128xf32> to vector<4x32xf32>
    %251 = vector.extract_strided_slice %246 {offsets = [0, 96], sizes = [4, 32], strides = [1, 1]} : vector<4x128xf32> to vector<4x32xf32>
    %252 = arith.mulf %249, %216 : vector<4x32xf32>
    %253 = arith.mulf %248, %250 : vector<4x32xf32>
    %254 = arith.addf %252, %253 : vector<4x32xf32>
    %255 = math.tanh %254 : vector<4x32xf32>
    %256 = arith.mulf %251, %255 : vector<4x32xf32>
    %cst_46 = arith.constant dense<0.000000e+00> : vector<4x128xf32>
    %257 = tpu.matmul %256, %1, %cst_46 {dimension_numbers = #tpu.dot_dimension_numbers<[1], [0], [0], [1], [0, 0, 1, 1], [], []>} : vector<4x32xf32>, vector<32x128xf32>, vector<4x128xf32> -> vector<4x128xf32>
    %258 = vector.broadcast %3 : vector<1x128xf32> to vector<4x128xf32>
    %259 = arith.addf %257, %258 : vector<4x128xf32>
    %cst_47 = arith.constant dense<0.000000e+00> : vector<4x128xf32>
    %260 = tpu.matmul %238, %2, %cst_47 {dimension_numbers = #tpu.dot_dimension_numbers<[1], [0], [0], [1], [0, 0, 1, 1], [], []>} : vector<4x32xf32>, vector<32x128xf32>, vector<4x128xf32> -> vector<4x128xf32>
    %261 = arith.addf %259, %260 : vector<4x128xf32>
    %262 = arith.negf %261 : vector<4x128xf32>
    %263 = math.exp %262 : vector<4x128xf32>
    %cst_48 = arith.constant 1.000000e+00 : f32
    %264 = vector.broadcast %cst_48 : f32 to vector<4x128xf32>
    %265 = arith.addf %264, %263 : vector<4x128xf32>
    %266 = arith.divf %264, %265 : vector<4x128xf32>
    %267 = math.tanh %261 : vector<4x128xf32>
    %268 = vector.extract_strided_slice %266 {offsets = [0, 0], sizes = [4, 32], strides = [1, 1]} : vector<4x128xf32> to vector<4x32xf32>
    %269 = vector.extract_strided_slice %266 {offsets = [0, 32], sizes = [4, 32], strides = [1, 1]} : vector<4x128xf32> to vector<4x32xf32>
    %270 = vector.extract_strided_slice %267 {offsets = [0, 64], sizes = [4, 32], strides = [1, 1]} : vector<4x128xf32> to vector<4x32xf32>
    %271 = vector.extract_strided_slice %266 {offsets = [0, 96], sizes = [4, 32], strides = [1, 1]} : vector<4x128xf32> to vector<4x32xf32>
    %272 = arith.mulf %269, %236 : vector<4x32xf32>
    %273 = arith.mulf %268, %270 : vector<4x32xf32>
    %274 = arith.addf %272, %273 : vector<4x32xf32>
    %275 = math.tanh %274 : vector<4x32xf32>
    %276 = arith.mulf %271, %275 : vector<4x32xf32>
    %277 = vector.extract_strided_slice %9 {offsets = [28, 0], sizes = [4, 128], strides = [1, 1]} : vector<32x128xf32> to vector<4x128xf32>
    %cst_49 = arith.constant dense<0.000000e+00> : vector<4x128xf32>
    %278 = tpu.matmul %256, %0, %cst_49 {dimension_numbers = #tpu.dot_dimension_numbers<[1], [0], [0], [1], [0, 0, 1, 1], [], []>} : vector<4x32xf32>, vector<32x128xf32>, vector<4x128xf32> -> vector<4x128xf32>
    %279 = arith.addf %277, %278 : vector<4x128xf32>
    %280 = arith.negf %279 : vector<4x128xf32>
    %281 = math.exp %280 : vector<4x128xf32>
    %cst_50 = arith.constant 1.000000e+00 : f32
    %282 = vector.broadcast %cst_50 : f32 to vector<4x128xf32>
    %283 = arith.addf %282, %281 : vector<4x128xf32>
    %284 = arith.divf %282, %283 : vector<4x128xf32>
    %285 = math.tanh %279 : vector<4x128xf32>
    %286 = vector.extract_strided_slice %284 {offsets = [0, 0], sizes = [4, 32], strides = [1, 1]} : vector<4x128xf32> to vector<4x32xf32>
    %287 = vector.extract_strided_slice %284 {offsets = [0, 32], sizes = [4, 32], strides = [1, 1]} : vector<4x128xf32> to vector<4x32xf32>
    %288 = vector.extract_strided_slice %285 {offsets = [0, 64], sizes = [4, 32], strides = [1, 1]} : vector<4x128xf32> to vector<4x32xf32>
    %289 = vector.extract_strided_slice %284 {offsets = [0, 96], sizes = [4, 32], strides = [1, 1]} : vector<4x128xf32> to vector<4x32xf32>
    %290 = arith.mulf %287, %254 : vector<4x32xf32>
    %291 = arith.mulf %286, %288 : vector<4x32xf32>
    %292 = arith.addf %290, %291 : vector<4x32xf32>
    %293 = math.tanh %292 : vector<4x32xf32>
    %294 = arith.mulf %289, %293 : vector<4x32xf32>
    %cst_51 = arith.constant dense<0.000000e+00> : vector<4x128xf32>
    %295 = tpu.matmul %294, %1, %cst_51 {dimension_numbers = #tpu.dot_dimension_numbers<[1], [0], [0], [1], [0, 0, 1, 1], [], []>} : vector<4x32xf32>, vector<32x128xf32>, vector<4x128xf32> -> vector<4x128xf32>
    %296 = vector.broadcast %3 : vector<1x128xf32> to vector<4x128xf32>
    %297 = arith.addf %295, %296 : vector<4x128xf32>
    %cst_52 = arith.constant dense<0.000000e+00> : vector<4x128xf32>
    %298 = tpu.matmul %276, %2, %cst_52 {dimension_numbers = #tpu.dot_dimension_numbers<[1], [0], [0], [1], [0, 0, 1, 1], [], []>} : vector<4x32xf32>, vector<32x128xf32>, vector<4x128xf32> -> vector<4x128xf32>
    %299 = arith.addf %297, %298 : vector<4x128xf32>
    %300 = arith.negf %299 : vector<4x128xf32>
    %301 = math.exp %300 : vector<4x128xf32>
    %cst_53 = arith.constant 1.000000e+00 : f32
    %302 = vector.broadcast %cst_53 : f32 to vector<4x128xf32>
    %303 = arith.addf %302, %301 : vector<4x128xf32>
    %304 = arith.divf %302, %303 : vector<4x128xf32>
    %305 = math.tanh %299 : vector<4x128xf32>
    %306 = vector.extract_strided_slice %304 {offsets = [0, 0], sizes = [4, 32], strides = [1, 1]} : vector<4x128xf32> to vector<4x32xf32>
    %307 = vector.extract_strided_slice %304 {offsets = [0, 32], sizes = [4, 32], strides = [1, 1]} : vector<4x128xf32> to vector<4x32xf32>
    %308 = vector.extract_strided_slice %305 {offsets = [0, 64], sizes = [4, 32], strides = [1, 1]} : vector<4x128xf32> to vector<4x32xf32>
    %309 = vector.extract_strided_slice %304 {offsets = [0, 96], sizes = [4, 32], strides = [1, 1]} : vector<4x128xf32> to vector<4x32xf32>
    %310 = arith.mulf %307, %274 : vector<4x32xf32>
    %311 = arith.mulf %306, %308 : vector<4x32xf32>
    %312 = arith.addf %310, %311 : vector<4x32xf32>
    %313 = math.tanh %312 : vector<4x32xf32>
    %314 = arith.mulf %309, %313 : vector<4x32xf32>
    %cst_54 = arith.constant 0.000000e+00 : f32
    %315 = vector.broadcast %cst_54 : f32 to vector<4x32xf32>
    %316 = arith.cmpf oge, %314, %315 : vector<4x32xf32>
    %cst_55 = arith.constant 0.00999999977 : f32
    %317 = vector.broadcast %cst_55 : f32 to vector<4x32xf32>
    %318 = arith.mulf %317, %314 : vector<4x32xf32>
    %319 = arith.select %316, %314, %318 : vector<4x32xi1>, vector<4x32xf32>
    %c0_56 = arith.constant 0 : index
    %c0_57 = arith.constant 0 : index
    %320 = vector.load %arg8[%c0_56, %c0_57] : memref<32x256xf32, #tpu.memory_space<vmem>>, vector<32x256xf32>
    %cst_58 = arith.constant dense<0.000000e+00> : vector<4x256xf32>
    %321 = tpu.matmul %319, %320, %cst_58 {dimension_numbers = #tpu.dot_dimension_numbers<[1], [0], [0], [1], [0, 0, 1, 1], [], []>} : vector<4x32xf32>, vector<32x256xf32>, vector<4x256xf32> -> vector<4x256xf32>
    %c0_59 = arith.constant 0 : index
    %c0_60 = arith.constant 0 : index
    %322 = vector.load %arg10[%c0_59, %c0_60] : memref<1x256xf32, #tpu.memory_space<vmem>>, vector<1x256xf32>
    %323 = vector.broadcast %322 : vector<1x256xf32> to vector<4x256xf32>
    %324 = arith.addf %321, %323 : vector<4x256xf32>
    %c0_61 = arith.constant 0 : index
    %c0_62 = arith.constant 0 : index
    %325 = vector.load %arg1[%c0_61, %c0_62] : memref<4x1xf32, #tpu.memory_space<vmem>>, vector<4x1xf32>
    %cst_63 = arith.constant 0.000000e+00 : f32
    %326 = vector.broadcast %cst_63 : f32 to vector<4x1xf32>
    %327 = arith.cmpf oge, %325, %326 : vector<4x1xf32>
    %cst_64 = arith.constant 0.00999999977 : f32
    %328 = vector.broadcast %cst_64 : f32 to vector<4x1xf32>
    %329 = arith.mulf %328, %325 : vector<4x1xf32>
    %330 = arith.select %327, %325, %329 : vector<4x1xi1>, vector<4x1xf32>
    %c0_65 = arith.constant 0 : index
    %c0_66 = arith.constant 0 : index
    %331 = vector.load %arg9[%c0_65, %c0_66] : memref<1x256xf32, #tpu.memory_space<vmem>>, vector<1x256xf32>
    %332 = vector.broadcast %330 : vector<4x1xf32> to vector<4x256xf32>
    %333 = vector.broadcast %331 : vector<1x256xf32> to vector<4x256xf32>
    %334 = arith.mulf %332, %333 : vector<4x256xf32>
    %335 = arith.addf %324, %334 : vector<4x256xf32>
    %cst_67 = arith.constant 0.000000e+00 : f32
    %336 = vector.broadcast %cst_67 : f32 to vector<4x256xf32>
    %337 = arith.cmpf oge, %335, %336 : vector<4x256xf32>
    %cst_68 = arith.constant 0.00999999977 : f32
    %338 = vector.broadcast %cst_68 : f32 to vector<4x256xf32>
    %339 = arith.mulf %338, %335 : vector<4x256xf32>
    %340 = arith.select %337, %335, %339 : vector<4x256xi1>, vector<4x256xf32>
    %c0_69 = arith.constant 0 : index
    %c0_70 = arith.constant 0 : index
    %341 = vector.load %arg11[%c0_69, %c0_70] : memref<1x256xf32, #tpu.memory_space<vmem>>, vector<1x256xf32>
    %342 = vector.broadcast %341 : vector<1x256xf32> to vector<4x256xf32>
    %343 = arith.mulf %340, %342 : vector<4x256xf32>
    %cst_71 = arith.constant dense<0.000000e+00> : vector<4xf32>
    %344 = vector.multi_reduction <add>, %343, %cst_71 [1] : vector<4x256xf32> to vector<4xf32>
    %345 = vector.shape_cast %344 : vector<4xf32> to vector<4x1xf32>
    %c0_72 = arith.constant 0 : index
    %c0_73 = arith.constant 0 : index
    %346 = vector.load %arg12[%c0_72, %c0_73] : memref<1x1xf32, #tpu.memory_space<vmem>>, vector<1x1xf32>
    %347 = vector.broadcast %346 : vector<1x1xf32> to vector<4x1xf32>
    %348 = arith.addf %345, %347 : vector<4x1xf32>
    %c0_74 = arith.constant 0 : index
    %c0_75 = arith.constant 0 : index
    %349 = vector.load %arg13[%c0_74, %c0_75] : memref<4x1xf32, #tpu.memory_space<vmem>>, vector<4x1xf32>
    tpu.vector_store %arg13[%c0_74, %c0_75], %348 {strides = array<i32>} : memref<4x1xf32, #tpu.memory_space<vmem>>, vector<4x1xf32>,
    return
  }
}

</mosaic_0001>

<bundles_post_ra>
// kernel: tpu_custom_call.1
= control target key start
LH: loop header
LB: loop body
LE: loop exit
PB: predicated region body
PF: predicated region fallthrough
CT: control target
= control target key end

     0   :  { %s4002_s0 = inlined_call_operand.vmem [shape: f32[32,4], index: 0, kind: input, shape index: {}]   ;;  %s4003_s1 = inlined_call_operand.vmem [shape: f32[4,1], index: 1, kind: input, shape index: {}]   ;;  %s4004_s2 = inlined_call_operand.vmem [shape: f32[4,128], index: 2, kind: input, shape index: {}]   ;;  %s4005_s3 = inlined_call_operand.hbm [shape: f32[32,128], index: 3, kind: input, shape index: {}]   ;;  %s4006_s4 = inlined_call_operand.vmem [shape: f32[1,128], index: 4, kind: input, shape index: {}]   ;;  %s4007_s5 = inlined_call_operand.hbm [shape: f32[32,128], index: 5, kind: input, shape index: {}]   ;;  %s4008_s6 = inlined_call_operand.hbm [shape: f32[32,128], index: 6, kind: input, shape index: {}]   ;;  %s4009_s7 = inlined_call_operand.hbm [shape: f32[1,128], index: 7, kind: input, shape index: {}]   ;;  %s4010_s8 = inlined_call_operand.vmem [shape: f32[32,256], index: 8, kind: input, shape index: {}]   ;;  %s4011_s9 = inlined_call_operand.vmem [shape: f32[1,256], index: 9, kind: input, shape index: {}]   ;;  %s4012_s10 = inlined_call_operand.vmem [shape: f32[1,256], index: 10, kind: input, shape index: {}]   ;;  %s4013_s11 = inlined_call_operand.vmem [shape: f32[1,256], index: 11, kind: input, shape index: {}]   ;;  %s4014_s12 = inlined_call_operand.<no memory space> [shape: f32[1,1], index: 12, kind: input, shape index: {}]   ;;  %s4015_s13 = inlined_call_operand.vmem [shape: f32[4,1], index: 13, kind: output, shape index: {}]  }
   0x1   :  { %v18_v0 = vstv %s4014_s12 }
   0x2   :  { %19 = vst [vmem:[#allocation2] sm:$0x1] %v18_v0 }
   0x3   :  { %20 = vsyncpa [#allocation4], 0 }
   0x4   :  { %21 = vsyncpa [#allocation6], 0 }
   0x5   :  { %22 = vsyncpa [#allocation9], 0  ;;  %s3449_s27 = smov [#allocation5]   ;;  %s3450_s29 = smov [#allocation3]  }
   0x6   :  { %s48_s28 = sshll.u32 %s3449_s27, 4  ;;  %s34_s30 = sshll.u32 %s3450_s29, 4  ;;  %s49_s28 = int_to_ptr.vmem [resolvable:$true] %s48_s28  ;;  %s3534_s30 = int_to_ptr.vmem [resolvable:$true] %s34_s30 }
   0x7   :  { %s3355_s16 = scalar_lea.hbm %s4007_s5, 512 }
   0x8   :  { %p3356_p0 = scmp.ne.s32.totalorder %s4007_s5, %s3355_s16  ;;  %p3359_p1 = scmp.lt.u32.totalorder %s3355_s16, %s4007_s5 }
   0xa   :  { %p3361_p2 = pnand %p3359_p1, %p3356_p0 }
   0xc   :  { %3364 = shalt.err (!%p3361_p2)
}
   0xd   :  { %s3365_s20 = scalar_lea.vmem %s49_s28, 512  ;;  %p3370_p4 = scmp.lt.s32.totalorder %s49_s28, %s49_s28 }
   0xe   :  { %p3366_p3 = scmp.ne.s32.totalorder %s49_s28, %s3365_s20  ;;  %p3371_p5 = scmp.lt.s32.totalorder %s3365_s20, %s3365_s20 }
  0x10   :  { %p3372_p6 = por %p3371_p5, %p3370_p4 }
  0x12   :  { %p3373_p7 = pnand %p3372_p6, %p3366_p3 }
  0x14   :  { %3376 = shalt.err (!%p3373_p7)
}
  0x15   :  { %s3451_s21 = smov 128   ;;  %s3452_s22 = smov 8  }
  0x16   :  { %54 = dma.hbm_to_vmem [thread:$0]  %s4007_s5, 512, %s49_s28, [#allocation6], %s3451_s21, %s3451_s21, %s3452_s22  }
  0x17   :  { %s3377_s27 = scalar_lea.hbm %s4005_s3, 512 }
  0x18   :  { %p3378_p8 = scmp.ne.s32.totalorder %s4005_s3, %s3377_s27  ;;  %p3381_p9 = scmp.lt.u32.totalorder %s3377_s27, %s4005_s3 }
  0x1a   :  { %p3383_p10 = pnand %p3381_p9, %p3378_p8 }
  0x1c   :  { %3386 = shalt.err (!%p3383_p10)
}
  0x1d   :  { %s3387_s17 = scalar_lea.vmem %s3534_s30, 512  ;;  %p3392_p12 = scmp.lt.s32.totalorder %s3534_s30, %s3534_s30 }
  0x1e   :  { %p3388_p11 = scmp.ne.s32.totalorder %s3534_s30, %s3387_s17  ;;  %p3393_p13 = scmp.lt.s32.totalorder %s3387_s17, %s3387_s17 }
  0x20   :  { %p3394_p0 = por %p3393_p13, %p3392_p12 }
  0x22   :  { %p3395_p1 = pnand %p3394_p0, %p3388_p11 }
  0x24   :  { %3398 = shalt.err (!%p3395_p1)
}
  0x25   :  { %40 = dma.hbm_to_vmem [thread:$0]  %s4005_s3, 512, %s3534_s30, [#allocation4], %s3451_s21, %s3451_s21, %s3452_s22  }
  0x26   :  { %s3453_s18 = smov [#allocation7]   ;;  %s3454_s19 = smov [#allocation8]  }
  0x27   :  { %s60_s12 = sshll.u32 %s3453_s18, 4  ;;  %s73_s20 = sshll.u32 %s3454_s19, 4  ;;  %s61_s12 = int_to_ptr.vmem [resolvable:$true] %s60_s12  ;;  %s74_s20 = int_to_ptr.vmem [resolvable:$true] %s73_s20 }
  0x28   :  { %s3399_s25 = scalar_lea.hbm %s4008_s6, 512 }
  0x29   :  { %p3400_p2 = scmp.ne.s32.totalorder %s4008_s6, %s3399_s25  ;;  %p3403_p3 = scmp.lt.u32.totalorder %s3399_s25, %s4008_s6 }
  0x2b   :  { %p3405_p4 = pnand %p3403_p3, %p3400_p2 }
  0x2d   :  { %3408 = shalt.err (!%p3405_p4)
}
  0x2e   :  { %s3409_s3 = scalar_lea.vmem %s61_s12, 512  ;;  %p3414_p6 = scmp.lt.s32.totalorder %s61_s12, %s61_s12 }
  0x2f   :  { %p3410_p5 = scmp.ne.s32.totalorder %s61_s12, %s3409_s3  ;;  %p3415_p7 = scmp.lt.s32.totalorder %s3409_s3, %s3409_s3 }
  0x31   :  { %p3416_p8 = por %p3415_p7, %p3414_p6 }
  0x33   :  { %p3417_p9 = pnand %p3416_p8, %p3410_p5 }
  0x35   :  { %3420 = shalt.err (!%p3417_p9)
}
  0x36   :  { %66 = dma.hbm_to_vmem [thread:$0]  %s4008_s6, 512, %s61_s12, [#allocation6], %s3451_s21, %s3451_s21, %s3452_s22  }
  0x37   :  { %s3421_s5 = scalar_lea.hbm %s4009_s7, 16 }
  0x38   :  { %p3422_p10 = scmp.ne.s32.totalorder %s4009_s7, %s3421_s5  ;;  %p3425_p11 = scmp.lt.u32.totalorder %s3421_s5, %s4009_s7 }
  0x3a   :  { %p3427_p12 = pnand %p3425_p11, %p3422_p10 }
  0x3c   :  { %3430 = shalt.err (!%p3427_p12)
}
  0x3d   :  { %s3431_s24 = scalar_lea.vmem %s74_s20, 16  ;;  %s3435_s25 = scalar_lea.vmem %s74_s20, 32 }
  0x3e   :  { %p3432_p13 = scmp.ne.s32.totalorder %s74_s20, %s3431_s24  ;;  %p3436_p0 = scmp.lt.s32.totalorder %s74_s20, %s74_s20 }
  0x3f   :  { %p3437_p1 = scmp.lt.s32.totalorder %s3435_s25, %s3431_s24 }
  0x41   :  { %p3438_p2 = por %p3437_p1, %p3436_p0 }
  0x43   :  { %p3439_p3 = pnand %p3438_p2, %p3432_p13 }
  0x45   :  { %3442 = shalt.err (!%p3439_p3)
}
  0x46   :  { %76 = dma.hbm_to_vmem [thread:$0]  %s4009_s7, 16, %s74_s20, [#allocation9]  }
  0x47   :  { %3443 = dma.done.wait [#allocation4], 512  }
  0x48   :  { %3444 = vsyncadd [#allocation4], 4294966784 }
  0x49   :  { %3445 = dma.done.wait [#allocation6], 1024  }
  0x4a   :  { %3446 = vsyncadd [#allocation6], 4294966272 }
  0x4b   :  { %3447 = dma.done.wait [#allocation9], 16  }
  0x4c   :  { %3448 = vsyncadd [#allocation9], 4294967280  ;;  %v3455_v1 = vmov 0.0|0.0   ;;  %vm3456_vm0 = vmmov 0   ;;  %v3457_v2 = vmov 0.0   ;;  %vm137_vm1 = vcmask 1043456  }
  0x4d   :  { %3038 = vmatprep.subr.bf16.mxu1 %v3455_v1  ;;  %2782 = vmatprep.mubr.msk.f32.mxu1 %vm3456_vm0, %v3457_v2  ;;  %vm124_vm2 = vcmask 31744   ;;  %v99_v3 = vld [vmem:[#allocation3] sm:$0xff]  ;;  %v100_v4 = vld [vmem:[#allocation3 + $0x8] sm:$0xff]  ;;  %v101_v9 = vld [vmem:[#allocation3 + $0x10] sm:$0xff]  ;;  %s3458_s14 = smov 64   ;;  %vm226_vm3 = vcmask 261120  }
  0x4e   :  { %v116_v5 = vld [vmem:[%s4004_s2] sm:$0xf]  ;;  %v3604_v6 = vpack.c.bf16 %v100_v4, %v99_v3  ;;  %v113_v8 = vld [vmem:[%s4002_s0 + $0x8] sm:$0xff]  ;;  %v114_v31 = vld [vmem:[%s4002_s0 + $0x10] sm:$0xff]  ;;  %vm2585_vm8 = vcmask 3072  }
  0x4f   :  { %2766 = vmatprep.subr.msk.mxu0 %vm137_vm1, %v116_v5  ;;  %v112_v7 = vld [vmem:[%s4002_s0] sm:$0xff]  ;;  %v104_v30 = vld [vmem:[#allocation5 + $0x8] sm:$0xff]  ;;  %v115_v33 = vld [vmem:[%s4002_s0 + $0x18] sm:$0xff] }
  0x50   :  { %2767 = vmatpush3.msk.msra.mxu0 %vm137_vm1, %v116_v5  ;;  %2768 = vmatprep.mubr.msk.f32.mxu0 %vm124_vm2, %v112_v7  ;;  %v102_v10 = vld [vmem:[#allocation3 + $0x18] sm:$0xff]  ;;  %v103_v29 = vld [vmem:[#allocation5] sm:$0xff]  ;;  %v105_v34 = vld [vmem:[#allocation5 + $0x10] sm:$0xff] }
  0x51   :  { %3040 = vmatpush3.bf16.msra.mxu1 %v3604_v6  ;;  %2769 = vmatmul.mubr.msk.f32.vlgmr.msra.gmra.mrb[0].mxu0 %vm124_vm2, %v113_v8  ;;  %v3617_v11 = vpack.c.bf16 %v102_v10, %v101_v9  ;;  %v3635_v13 = vld [vmem:[%s4006_s4] ss:$0 sm:$0xff]  ;;  %s3459_s4 = smov 32   ;;  %v3649_v32 = vpack.c.bf16 %v104_v30, %v103_v29  ;;  %v107_v40 = vld [vmem:[#allocation7] sm:$0xff]  ;;  %v108_v41 = vld [vmem:[#allocation7 + $0x8] sm:$0xff] }
  0x52   :  { %3041 = vmatprep.subr.bf16.mxu1 %v3455_v1  ;;  %3044 = vmatprep.subr.bf16.mxu0 %v3455_v1  ;;  %v106_v35 = vld [vmem:[#allocation5 + $0x18] sm:$0xff]  ;;  %v3666_v42 = vpack.c.bf16 %v108_v41, %v107_v40  ;;  %v109_v43 = vld [vmem:[#allocation7 + $0x10] sm:$0xff]  ;;  %v3696_v53 = vld [vmem:[#allocation8] ss:$0 sm:$0xff] }
  0x53   :  { %2771 = vmatprep.mubr.msk.f32.mxu0 %vm124_vm2, %v114_v31  ;;  %3046 = vmatpush3.bf16.msra.mxu0 %v3649_v32  ;;  %v3657_v36 = vpack.c.bf16 %v106_v35, %v105_v34  ;;  %v110_v44 = vld [vmem:[#allocation7 + $0x18] sm:$0xff] }
  0x54   :  { %3047 = vmatprep.subr.bf16.mxu0 %v3455_v1  ;;  %v3671_v46 = vpack.c.bf16 %v110_v44, %v109_v43 }
  0x55   :  { %3043 = vmatpush3.bf16.msra.mxu1 %v3617_v11  ;;  %2772 = vmatmul.mubr.msk.f32.gmra.mrb[2].mxu0 %vm124_vm2, %v115_v33 }
  0x56   :  { %3056 = vmatprep.subr.bf16.mxu1 %v3455_v1  ;;  %2793 = vmatprep.mubr.msk.f32.mxu0 %vm3456_vm0, %v3457_v2 }
  0x57   :  { %3049 = vmatpush3.bf16.msra.mxu0 %v3657_v36 }
  0x58   :  { %2783 = vmatmul.mubr.f32.vlgmr.msra.gmra.mrb[0].mxu1 %v3457_v2  ;;  %3050 = vmatprep.subr.bf16.mxu0 %v3455_v1 }
  0x59   :  { %3058 = vmatpush3.bf16.msra.mxu1 %v3604_v6  ;;  %2815 = vmatprep.mubr.msk.f32.mxu1 %vm3456_vm0, %v3457_v2 }
  0x5a   :  { %3059 = vmatprep.subr.bf16.mxu1 %v3455_v1 }
  0x5d   :  { %3061 = vmatpush3.bf16.msra.mxu1 %v3617_v11 }
  0x5e   :  { %3062 = vmatprep.subr.bf16.mxu1 %v3455_v1 }
 0x124   :  { %v3630_v12 = vpop.f32.mrb[0].mxu0 }
 0x125   :  { %v207_v14 = vpop.f32.mrb[1].mxu0  ;;  %v3737_v29 = vadd.f32 %v3630_v12, %v3635_v13 }
 0x126   :  { %v3638_v15 = vadd.f32 %v3635_v13, %v207_v14 }
 0x128   :  { %v3691_v47 = vpop.f32.mrb[2].mxu0 }
 0x129   :  { %v3693_v48 = vpop.f32.mrb[3].mxu0 }
 0x12b   :  { %v296_v16 = vpop.f32.mrb[0].mxu1 }
 0x12c   :  { %v300_v17 = vadd.f32 %v296_v16, %v3638_v15  ;;  %v2784_v18 = vpop.f32.mrb[1].mxu1 }
 0x12e   :  { %3227 = vtanh.f32 %v300_v17  ;;  %v2600_v20 = vmul.f32 -1.442695, %v300_v17 }
 0x130   :  { %3229 = vpow2.f32 %v2600_v20 }
 0x138   :  { %v3228_v19 = vpop.eup %3227 }
 0x139   :  { %310 = vrot.lane.b32.xlu0 %v3228_v19, %s3458_s14 }
 0x13a   :  { %v3230_v21 = vpop.eup %3229 }
 0x13b   :  { %v304_v22 = vadd.f32 1.0, %v3230_v21 }
 0x13d   :  { %3231 = vrcp.f32 %v304_v22 }
 0x147   :  { %v3232_v23 = vpop.eup %3231 }
 0x148   :  { %v308_v26 = vmul.f32 0.0, %v3232_v23 }
 0x1ab   :  { %v311_v24 = vpop.permute.xlu0 %310 }
 0x1ac   :  { %v313_v25 = vmul.f32 %v3232_v23, %v311_v24 }
 0x1ae   :  { %315 = vrot.lane.b32.xlu0 %v313_v25, %s3459_s4 }
 0x220   :  { %v316_v27 = vpop.permute.xlu0 %315 }
 0x221   :  { %v3643_v28 = vadd.f32 %v316_v27, %v308_v26 }
 0x223   :  { %3233 = vtanh.f32 %v3643_v28  ;;  %v583_v10 = vrot.slane %v3643_v28, 4 }
 0x22d   :  { %v3234_v37 = vpop.eup %3233 }
 0x22e   :  { %321 = vrot.lane.b32.xlu1 %v3234_v37, %s3458_s14 }
 0x2a0   :  { %v322_v38 = vpop.permute.xlu1 %321 }
 0x2a1   :  { %v324_v39 = vmul.f32 %v3232_v23, %v322_v38 }
 0x2a3   :  { %332 = vrot.lane.b32.xlu1 %v324_v39, %s3459_s4 }
 0x315   :  { %v333_v45 = vpop.permute.xlu1 %332 }
 0x316   :  { %2794 = vmatmul.mubr.msk.f32.vlgmr.msra.gmra.mrb[4].mxu0 %vm226_vm3, %v333_v45  ;;  %2816 = vmatmul.mubr.msk.f32.vlgmr.msra.gmra.mrb[2].mxu1 %vm226_vm3, %v333_v45 }
 0x317   :  { %3052 = vmatpush3.bf16.msra.mxu0 %v3666_v42  ;;  %2804 = vmatprep.mubr.msk.f32.mxu0 %vm3456_vm0, %v3457_v2 }
 0x318   :  { %3053 = vmatprep.subr.bf16.mxu0 %v3455_v1  ;;  %3064 = vmatpush3.bf16.msra.mxu1 %v3649_v32 }
 0x319   :  { %3065 = vmatprep.subr.bf16.mxu1 %v3455_v1  ;;  %2826 = vmatprep.mubr.msk.f32.mxu1 %vm3456_vm0, %v3457_v2 }
 0x31b   :  { %3055 = vmatpush3.bf16.msra.mxu0 %v3671_v46 }
 0x31c   :  { %3074 = vmatprep.subr.bf16.mxu0 %v3455_v1  ;;  %3067 = vmatpush3.bf16.msra.mxu1 %v3657_v36 }
 0x31d   :  { %3068 = vmatprep.subr.bf16.mxu1 %v3455_v1 }
 0x31e   :  { %2805 = vmatmul.mubr.f32.vlgmr.msra.gmra.mrb[4].mxu0 %v3457_v2 }
 0x31f   :  { %3076 = vmatpush3.bf16.msra.mxu0 %v3604_v6  ;;  %2848 = vmatprep.mubr.msk.f32.mxu0 %vm3456_vm0, %v3457_v2 }
 0x320   :  { %3077 = vmatprep.subr.bf16.mxu0 %v3455_v1 }
 0x323   :  { %3079 = vmatpush3.bf16.msra.mxu0 %v3617_v11 }
 0x324   :  { %3080 = vmatprep.subr.bf16.mxu0 %v3455_v1 }
 0x3e9   :  { %v567_v49 = vpop.f32.mrb[2].mxu1 }
 0x3ea   :  { %v572_v50 = vrot.slane %v567_v49, 4  ;;  %v2817_v51 = vpop.f32.mrb[3].mxu1 }
 0x3ec   :  { %v574_v52 = vadd.f32 %v572_v50, %v3638_v15 }
 0x3ee   :  { %3235 = vtanh.f32 %v574_v52  ;;  %v2605_v59 = vmul.f32 -1.442695, %v574_v52 }
 0x3f1   :  { %v472_v54 = vpop.f32.mrb[4].mxu0 }
 0x3f2   :  { %v3190_v55 = vadd.f32 %v3696_v53, %v472_v54  ;;  %v2806_v56 = vpop.f32.mrb[5].mxu0 }
 0x3f4   :  { %3237 = vtanh.f32 %v3190_v55  ;;  %v2603_v60 = vmul.f32 -1.442695, %v3190_v55 }
 0x3f5   :  { %3239 = vpow2.f32 %v2605_v59 }
 0x3f6   :  { %3241 = vpow2.f32 %v2603_v60 }
 0x3f8   :  { %v3236_v57 = vpop.eup %3235 }
 0x3f9   :  { %587 = vrot.lane.b32.xlu0 %v3236_v57, %s3458_s14 }
 0x3fe   :  { %v3238_v58 = vpop.eup %3237 }
 0x3ff   :  { %486 = vrot.lane.b32.xlu1 %v3238_v58, %s3458_s14  ;;  %v3240_v61 = vpop.eup %3239 }
 0x400   :  { %v578_v62 = vadd.f32 1.0, %v3240_v61  ;;  %v3242_v63 = vpop.eup %3241 }
 0x401   :  { %v480_v0 = vadd.f32 1.0, %v3242_v63 }
 0x402   :  { %3243 = vrcp.f32 %v578_v62 }
 0x403   :  { %3245 = vrcp.f32 %v480_v0 }
 0x40c   :  { %v3244_v3 = vpop.eup %3243 }
 0x40d   :  { %v3246_v7 = vpop.eup %3245  ;;  %v585_v14 = vmul.f32 %v3244_v3, %v583_v10 }
 0x40e   :  { %v484_v17 = vmul.f32 0.0, %v3246_v7 }
 0x46b   :  { %v588_v4 = vpop.permute.xlu0 %587 }
 0x46c   :  { %v590_v5 = vmul.f32 %v3244_v3, %v588_v4 }
 0x46e   :  { %592 = vrot.lane.b32.xlu0 %v590_v5, %s3459_s4 }
 0x471   :  { %v487_v8 = vpop.permute.xlu1 %486 }
 0x472   :  { %v489_v9 = vmul.f32 %v3246_v7, %v487_v8 }
 0x474   :  { %491 = vrot.lane.b32.xlu1 %v489_v9, %s3459_s4 }
 0x4e0   :  { %v593_v15 = vpop.permute.xlu0 %592 }
 0x4e1   :  { %v3704_v16 = vadd.f32 %v593_v15, %v585_v14 }
 0x4e3   :  { %3247 = vtanh.f32 %v3704_v16  ;;  %v857_v56 = vrot.slane %v3704_v16, 4 }
 0x4e6   :  { %v492_v18 = vpop.permute.xlu1 %491 }
 0x4e7   :  { %v3707_v19 = vadd.f32 %v492_v18, %v484_v17 }
 0x4e9   :  { %3249 = vtanh.f32 %v3707_v19 }
 0x4ed   :  { %v3248_v20 = vpop.eup %3247 }
 0x4ee   :  { %598 = vrot.lane.b32.xlu0 %v3248_v20, %s3458_s14 }
 0x4f3   :  { %v3250_v21 = vpop.eup %3249 }
 0x4f4   :  { %497 = vrot.lane.b32.xlu1 %v3250_v21, %s3458_s14 }
 0x560   :  { %v599_v22 = vpop.permute.xlu0 %598 }
 0x561   :  { %v601_v23 = vmul.f32 %v3244_v3, %v599_v22 }
 0x563   :  { %v603_v24 = vrot.slane %v601_v23, 4 }
 0x565   :  { %604 = vrot.lane.b32.xlu0 %v603_v24, %s3459_s4 }
 0x566   :  { %v498_v25 = vpop.permute.xlu1 %497 }
 0x567   :  { %v500_v26 = vmul.f32 %v3246_v7, %v498_v25 }
 0x569   :  { %679 = vrot.lane.b32.xlu1 %v500_v26, %s3459_s4 }
 0x5d7   :  { %v605_v27 = vpop.permute.xlu0 %604 }
 0x5d8   :  { %2827 = vmatmul.mubr.msk.f32.vlgmr.msra.gmra.mrb[4].mxu1 %vm226_vm3, %v605_v27  ;;  %2849 = vmatmul.mubr.msk.f32.vlgmr.msra.gmra.mrb[6].mxu0 %vm226_vm3, %v605_v27 }
 0x5d9   :  { %3070 = vmatpush3.bf16.msra.mxu1 %v3666_v42  ;;  %2837 = vmatprep.mubr.msk.f32.mxu1 %vm3456_vm0, %v3457_v2 }
 0x5da   :  { %3071 = vmatprep.subr.bf16.mxu1 %v3455_v1  ;;  %3082 = vmatpush3.bf16.msra.mxu0 %v3649_v32 }
 0x5db   :  { %3083 = vmatprep.subr.bf16.mxu0 %v3455_v1  ;;  %2859 = vmatprep.mubr.msk.f32.mxu0 %vm3456_vm0, %v3457_v2  ;;  %v680_v28 = vpop.permute.xlu1 %679 }
 0x5dd   :  { %3073 = vmatpush3.bf16.msra.mxu1 %v3671_v46 }
 0x5de   :  { %3092 = vmatprep.subr.bf16.mxu1 %v3455_v1  ;;  %3085 = vmatpush3.bf16.msra.mxu0 %v3657_v36 }
 0x5df   :  { %3086 = vmatprep.subr.bf16.mxu0 %v3455_v1 }
 0x5e0   :  { %2838 = vmatmul.mubr.msk.f32.vlgmr.msra.gmra.mrb[4].mxu1 %vm226_vm3, %v680_v28 }
 0x5e1   :  { %3094 = vmatpush3.bf16.msra.mxu1 %v3604_v6  ;;  %2881 = vmatprep.mubr.msk.f32.mxu1 %vm3456_vm0, %v3457_v2 }
 0x5e2   :  { %3095 = vmatprep.subr.bf16.mxu1 %v3455_v1 }
 0x5e5   :  { %3097 = vmatpush3.bf16.msra.mxu1 %v3617_v11 }
 0x5e6   :  { %3098 = vmatprep.subr.bf16.mxu1 %v3455_v1 }
 0x6ab   :  { %v844_v30 = vpop.f32.mrb[6].mxu0 }
 0x6ac   :  { %v848_v31 = vadd.f32 %v844_v30, %v3737_v29  ;;  %v2850_v33 = vpop.f32.mrb[7].mxu0 }
 0x6ae   :  { %3251 = vtanh.f32 %v848_v31  ;;  %v2610_v40 = vmul.f32 -1.442695, %v848_v31 }
 0x6b3   :  { %v749_v34 = vpop.f32.mrb[4].mxu1 }
 0x6b4   :  { %v3191_v35 = vadd.f32 %v3696_v53, %v749_v34  ;;  %v2839_v37 = vpop.f32.mrb[5].mxu1 }
 0x6b6   :  { %3253 = vtanh.f32 %v3191_v35  ;;  %v2608_v12 = vmul.f32 -1.442695, %v3191_v35 }
 0x6b7   :  { %3255 = vpow2.f32 %v2610_v40 }
 0x6b8   :  { %v3252_v38 = vpop.eup %3251  ;;  %3257 = vpow2.f32 %v2608_v12 }
 0x6b9   :  { %861 = vrot.lane.b32.xlu0 %v3252_v38, %s3458_s14 }
 0x6c0   :  { %v3254_v39 = vpop.eup %3253 }
 0x6c1   :  { %763 = vrot.lane.b32.xlu1 %v3254_v39, %s3458_s14  ;;  %v3256_v41 = vpop.eup %3255 }
 0x6c2   :  { %v852_v43 = vadd.f32 1.0, %v3256_v41  ;;  %v3258_v44 = vpop.eup %3257 }
 0x6c3   :  { %v757_v45 = vadd.f32 1.0, %v3258_v44 }
 0x6c4   :  { %3259 = vrcp.f32 %v852_v43 }
 0x6c5   :  { %3261 = vrcp.f32 %v757_v45 }
 0x6ce   :  { %v3260_v49 = vpop.eup %3259 }
 0x6cf   :  { %v3262_v52 = vpop.eup %3261  ;;  %v859_v57 = vmul.f32 %v3260_v49, %v857_v56  ;;  %v3819_v56 = vadd.f32 %v3635_v13, %v3693_v48 }
 0x6d0   :  { %v761_v60 = vmul.f32 %v3262_v52, %v3707_v19 }
 0x72b   :  { %v862_v50 = vpop.permute.xlu0 %861 }
 0x72c   :  { %v864_v51 = vmul.f32 %v3260_v49, %v862_v50 }
 0x72e   :  { %866 = vrot.lane.b32.xlu0 %v864_v51, %s3459_s4 }
 0x733   :  { %v764_v54 = vpop.permute.xlu1 %763 }
 0x734   :  { %v766_v55 = vmul.f32 %v3262_v52, %v764_v54 }
 0x736   :  { %768 = vrot.lane.b32.xlu1 %v766_v55, %s3459_s4 }
 0x7a0   :  { %v867_v58 = vpop.permute.xlu0 %866 }
 0x7a1   :  { %v3746_v59 = vadd.f32 %v867_v58, %v859_v57 }
 0x7a3   :  { %3263 = vtanh.f32 %v3746_v59  ;;  %v1133_v35 = vrot.slane %v3746_v59, 4 }
 0x7a8   :  { %v769_v61 = vpop.permute.xlu1 %768 }
 0x7a9   :  { %v3750_v62 = vadd.f32 %v769_v61, %v761_v60 }
 0x7ab   :  { %3265 = vtanh.f32 %v3750_v62 }
 0x7ad   :  { %v3264_v63 = vpop.eup %3263 }
 0x7ae   :  { %872 = vrot.lane.b32.xlu0 %v3264_v63, %s3458_s14 }
 0x7b5   :  { %v3266_v0 = vpop.eup %3265 }
 0x7b6   :  { %774 = vrot.lane.b32.xlu1 %v3266_v0, %s3458_s14 }
 0x820   :  { %v873_v3 = vpop.permute.xlu0 %872 }
 0x821   :  { %v875_v4 = vmul.f32 %v3260_v49, %v873_v3 }
 0x823   :  { %877 = vrot.lane.b32.xlu0 %v875_v4, %s3459_s4 }
 0x828   :  { %v775_v5 = vpop.permute.xlu1 %774 }
 0x829   :  { %v777_v7 = vmul.f32 %v3262_v52, %v775_v5 }
 0x82b   :  { %952 = vrot.lane.b32.xlu1 %v777_v7, %s3459_s4 }
 0x895   :  { %v878_v8 = vpop.permute.xlu0 %877 }
 0x896   :  { %2860 = vmatmul.mubr.msk.f32.vlgmr.msra.gmra.mrb[8].mxu0 %vm226_vm3, %v878_v8  ;;  %2882 = vmatmul.mubr.msk.f32.vlgmr.msra.gmra.mrb[6].mxu1 %vm226_vm3, %v878_v8 }
 0x897   :  { %3088 = vmatpush3.bf16.msra.mxu0 %v3666_v42  ;;  %2870 = vmatprep.mubr.msk.f32.mxu0 %vm3456_vm0, %v3457_v2 }
 0x898   :  { %3089 = vmatprep.subr.bf16.mxu0 %v3455_v1  ;;  %3100 = vmatpush3.bf16.msra.mxu1 %v3649_v32 }
 0x899   :  { %3101 = vmatprep.subr.bf16.mxu1 %v3455_v1  ;;  %2892 = vmatprep.mubr.msk.f32.mxu1 %vm3456_vm0, %v3457_v2 }
 0x89b   :  { %3091 = vmatpush3.bf16.msra.mxu0 %v3671_v46 }
 0x89c   :  { %3110 = vmatprep.subr.bf16.mxu0 %v3455_v1  ;;  %3103 = vmatpush3.bf16.msra.mxu1 %v3657_v36 }
 0x89d   :  { %v953_v9 = vpop.permute.xlu1 %952  ;;  %3104 = vmatprep.subr.bf16.mxu1 %v3455_v1 }
 0x89e   :  { %2871 = vmatmul.mubr.msk.f32.vlgmr.msra.gmra.mrb[8].mxu0 %vm226_vm3, %v953_v9 }
 0x89f   :  { %3112 = vmatpush3.bf16.msra.mxu0 %v3604_v6  ;;  %2914 = vmatprep.mubr.msk.f32.mxu0 %vm3456_vm0, %v3457_v2 }
 0x8a0   :  { %3113 = vmatprep.subr.bf16.mxu0 %v3455_v1 }
 0x8a3   :  { %3115 = vmatpush3.bf16.msra.mxu0 %v3617_v11 }
 0x8a4   :  { %3116 = vmatprep.subr.bf16.mxu0 %v3455_v1 }
 0x969   :  { %v1117_v10 = vpop.f32.mrb[6].mxu1 }
 0x96a   :  { %v1122_v14 = vrot.slane %v1117_v10, 4  ;;  %v2883_v15 = vpop.f32.mrb[7].mxu1 }
 0x96c   :  { %v1124_v16 = vadd.f32 %v1122_v14, %v3737_v29 }
 0x96e   :  { %3267 = vtanh.f32 %v1124_v16  ;;  %v2615_v22 = vmul.f32 -1.442695, %v1124_v16 }
 0x971   :  { %v1022_v17 = vpop.f32.mrb[8].mxu0 }
 0x972   :  { %v3192_v18 = vadd.f32 %v3696_v53, %v1022_v17  ;;  %v2872_v19 = vpop.f32.mrb[9].mxu0 }
 0x974   :  { %3269 = vtanh.f32 %v3192_v18  ;;  %v2613_v23 = vmul.f32 -1.442695, %v3192_v18 }
 0x975   :  { %3271 = vpow2.f32 %v2615_v22 }
 0x976   :  { %3273 = vpow2.f32 %v2613_v23 }
 0x978   :  { %v3268_v20 = vpop.eup %3267 }
 0x979   :  { %1137 = vrot.lane.b32.xlu0 %v3268_v20, %s3458_s14 }
 0x97e   :  { %v3270_v21 = vpop.eup %3269 }
 0x97f   :  { %1036 = vrot.lane.b32.xlu1 %v3270_v21, %s3458_s14  ;;  %v3272_v24 = vpop.eup %3271 }
 0x980   :  { %v1128_v25 = vadd.f32 1.0, %v3272_v24  ;;  %v3274_v26 = vpop.eup %3273 }
 0x981   :  { %v1030_v27 = vadd.f32 1.0, %v3274_v26 }
 0x982   :  { %3275 = vrcp.f32 %v1128_v25 }
 0x983   :  { %3277 = vrcp.f32 %v1030_v27 }
 0x98c   :  { %v3276_v28 = vpop.eup %3275 }
 0x98d   :  { %v3278_v31 = vpop.eup %3277  ;;  %v1135_v37 = vmul.f32 %v3276_v28, %v1133_v35 }
 0x98e   :  { %v1034_v40 = vmul.f32 %v3278_v31, %v3750_v62 }
 0x9eb   :  { %v1138_v29 = vpop.permute.xlu0 %1137 }
 0x9ec   :  { %v1140_v30 = vmul.f32 %v3276_v28, %v1138_v29 }
 0x9ee   :  { %1142 = vrot.lane.b32.xlu0 %v1140_v30, %s3459_s4 }
 0x9f1   :  { %v1037_v33 = vpop.permute.xlu1 %1036 }
 0x9f2   :  { %v1039_v34 = vmul.f32 %v3278_v31, %v1037_v33 }
 0x9f4   :  { %1041 = vrot.lane.b32.xlu1 %v1039_v34, %s3459_s4 }
 0xa60   :  { %v1143_v38 = vpop.permute.xlu0 %1142 }
 0xa61   :  { %v3785_v39 = vadd.f32 %v1143_v38, %v1135_v37 }
 0xa63   :  { %3279 = vtanh.f32 %v3785_v39  ;;  %v1407_v18 = vrot.slane %v3785_v39, 4 }
 0xa66   :  { %v1042_v12 = vpop.permute.xlu1 %1041 }
 0xa67   :  { %v3789_v41 = vadd.f32 %v1042_v12, %v1034_v40 }
 0xa69   :  { %3281 = vtanh.f32 %v3789_v41 }
 0xa6d   :  { %v3280_v43 = vpop.eup %3279 }
 0xa6e   :  { %1148 = vrot.lane.b32.xlu0 %v3280_v43, %s3458_s14 }
 0xa73   :  { %v3282_v44 = vpop.eup %3281 }
 0xa74   :  { %1047 = vrot.lane.b32.xlu1 %v3282_v44, %s3458_s14 }
 0xae0   :  { %v1149_v45 = vpop.permute.xlu0 %1148 }
 0xae1   :  { %v1151_v49 = vmul.f32 %v3276_v28, %v1149_v45 }
 0xae3   :  { %v1153_v50 = vrot.slane %v1151_v49, 4 }
 0xae5   :  { %1154 = vrot.lane.b32.xlu0 %v1153_v50, %s3459_s4 }
 0xae6   :  { %v1048_v51 = vpop.permute.xlu1 %1047 }
 0xae7   :  { %v1050_v52 = vmul.f32 %v3278_v31, %v1048_v51 }
 0xae9   :  { %1229 = vrot.lane.b32.xlu1 %v1050_v52, %s3459_s4 }
 0xb57   :  { %v1155_v54 = vpop.permute.xlu0 %1154 }
 0xb58   :  { %2893 = vmatmul.mubr.msk.f32.vlgmr.msra.gmra.mrb[8].mxu1 %vm226_vm3, %v1155_v54  ;;  %2915 = vmatmul.mubr.msk.f32.vlgmr.msra.gmra.mrb[10].mxu0 %vm226_vm3, %v1155_v54 }
 0xb59   :  { %3106 = vmatpush3.bf16.msra.mxu1 %v3666_v42  ;;  %2903 = vmatprep.mubr.msk.f32.mxu1 %vm3456_vm0, %v3457_v2 }
 0xb5a   :  { %3107 = vmatprep.subr.bf16.mxu1 %v3455_v1  ;;  %3118 = vmatpush3.bf16.msra.mxu0 %v3649_v32 }
 0xb5b   :  { %3119 = vmatprep.subr.bf16.mxu0 %v3455_v1  ;;  %2925 = vmatprep.mubr.msk.f32.mxu0 %vm3456_vm0, %v3457_v2  ;;  %v1230_v55 = vpop.permute.xlu1 %1229 }
 0xb5d   :  { %3109 = vmatpush3.bf16.msra.mxu1 %v3671_v46 }
 0xb5e   :  { %3128 = vmatprep.subr.bf16.mxu1 %v3455_v1  ;;  %3121 = vmatpush3.bf16.msra.mxu0 %v3657_v36 }
 0xb5f   :  { %3122 = vmatprep.subr.bf16.mxu0 %v3455_v1 }
 0xb60   :  { %2904 = vmatmul.mubr.msk.f32.vlgmr.msra.gmra.mrb[8].mxu1 %vm226_vm3, %v1230_v55 }
 0xb61   :  { %3130 = vmatpush3.bf16.msra.mxu1 %v3604_v6  ;;  %2947 = vmatprep.mubr.msk.f32.mxu1 %vm3456_vm0, %v3457_v2 }
 0xb62   :  { %3131 = vmatprep.subr.bf16.mxu1 %v3455_v1 }
 0xb65   :  { %3133 = vmatpush3.bf16.msra.mxu1 %v3617_v11 }
 0xb66   :  { %3134 = vmatprep.subr.bf16.mxu1 %v3455_v1 }
 0xc2b   :  { %v1394_v57 = vpop.f32.mrb[10].mxu0 }
 0xc2c   :  { %v1398_v58 = vadd.f32 %v1394_v57, %v3819_v56  ;;  %v2916_v59 = vpop.f32.mrb[11].mxu0 }
 0xc2e   :  { %3283 = vtanh.f32 %v1398_v58  ;;  %v2620_v3 = vmul.f32 -1.442695, %v1398_v58 }
 0xc33   :  { %v1299_v60 = vpop.f32.mrb[8].mxu1 }
 0xc34   :  { %v3193_v61 = vadd.f32 %v3696_v53, %v1299_v60  ;;  %v2905_v62 = vpop.f32.mrb[9].mxu1 }
 0xc36   :  { %3285 = vtanh.f32 %v3193_v61  ;;  %v2618_v48 = vmul.f32 -1.442695, %v3193_v61 }
 0xc37   :  { %3287 = vpow2.f32 %v2620_v3 }
 0xc38   :  { %v3284_v63 = vpop.eup %3283  ;;  %3289 = vpow2.f32 %v2618_v48 }
 0xc39   :  { %1411 = vrot.lane.b32.xlu0 %v3284_v63, %s3458_s14 }
 0xc40   :  { %v3286_v0 = vpop.eup %3285 }
 0xc41   :  { %1313 = vrot.lane.b32.xlu1 %v3286_v0, %s3458_s14  ;;  %v3288_v4 = vpop.eup %3287 }
 0xc42   :  { %v1402_v5 = vadd.f32 1.0, %v3288_v4  ;;  %v3290_v7 = vpop.eup %3289 }
 0xc43   :  { %v1307_v8 = vadd.f32 1.0, %v3290_v7 }
 0xc44   :  { %3291 = vrcp.f32 %v1402_v5 }
 0xc45   :  { %3293 = vrcp.f32 %v1307_v8 }
 0xc4e   :  { %v3292_v9 = vpop.eup %3291 }
 0xc4f   :  { %v3294_v15 = vpop.eup %3293  ;;  %v1409_v19 = vmul.f32 %v3292_v9, %v1407_v18 }
 0xc50   :  { %v1311_v22 = vmul.f32 %v3294_v15, %v3789_v41 }
 0xcab   :  { %v1412_v10 = vpop.permute.xlu0 %1411 }
 0xcac   :  { %v1414_v14 = vmul.f32 %v3292_v9, %v1412_v10 }
 0xcae   :  { %1416 = vrot.lane.b32.xlu0 %v1414_v14, %s3459_s4 }
 0xcb3   :  { %v1314_v16 = vpop.permute.xlu1 %1313 }
 0xcb4   :  { %v1316_v17 = vmul.f32 %v3294_v15, %v1314_v16 }
 0xcb6   :  { %1318 = vrot.lane.b32.xlu1 %v1316_v17, %s3459_s4  ;;  %v3901_v17 = vadd.f32 %v3691_v47, %v3635_v13 }
 0xd20   :  { %v1417_v20 = vpop.permute.xlu0 %1416 }
 0xd21   :  { %v3828_v21 = vadd.f32 %v1417_v20, %v1409_v19 }
 0xd23   :  { %3295 = vtanh.f32 %v3828_v21  ;;  %v1683_v60 = vrot.slane %v3828_v21, 4 }
 0xd28   :  { %v1319_v23 = vpop.permute.xlu1 %1318 }
 0xd29   :  { %v3832_v24 = vadd.f32 %v1319_v23, %v1311_v22 }
 0xd2b   :  { %3297 = vtanh.f32 %v3832_v24 }
 0xd2d   :  { %v3296_v25 = vpop.eup %3295 }
 0xd2e   :  { %1422 = vrot.lane.b32.xlu0 %v3296_v25, %s3458_s14 }
 0xd35   :  { %v3298_v26 = vpop.eup %3297 }
 0xd36   :  { %1324 = vrot.lane.b32.xlu1 %v3298_v26, %s3458_s14 }
 0xda0   :  { %v1423_v27 = vpop.permute.xlu0 %1422 }
 0xda1   :  { %v1425_v28 = vmul.f32 %v3292_v9, %v1423_v27 }
 0xda3   :  { %1427 = vrot.lane.b32.xlu0 %v1425_v28, %s3459_s4 }
 0xda8   :  { %v1325_v29 = vpop.permute.xlu1 %1324 }
 0xda9   :  { %v1327_v30 = vmul.f32 %v3294_v15, %v1325_v29 }
 0xdab   :  { %1502 = vrot.lane.b32.xlu1 %v1327_v30, %s3459_s4 }
 0xe15   :  { %v1428_v31 = vpop.permute.xlu0 %1427 }
 0xe16   :  { %2926 = vmatmul.mubr.msk.f32.vlgmr.msra.gmra.mrb[12].mxu0 %vm226_vm3, %v1428_v31  ;;  %2948 = vmatmul.mubr.msk.f32.vlgmr.msra.gmra.mrb[10].mxu1 %vm226_vm3, %v1428_v31 }
 0xe17   :  { %3124 = vmatpush3.bf16.msra.mxu0 %v3666_v42  ;;  %2936 = vmatprep.mubr.msk.f32.mxu0 %vm3456_vm0, %v3457_v2 }
 0xe18   :  { %3125 = vmatprep.subr.bf16.mxu0 %v3455_v1  ;;  %3136 = vmatpush3.bf16.msra.mxu1 %v3649_v32 }
 0xe19   :  { %3137 = vmatprep.subr.bf16.mxu1 %v3455_v1  ;;  %2958 = vmatprep.mubr.msk.f32.mxu1 %vm3456_vm0, %v3457_v2 }
 0xe1b   :  { %3127 = vmatpush3.bf16.msra.mxu0 %v3671_v46 }
 0xe1c   :  { %3146 = vmatprep.subr.bf16.mxu0 %v3455_v1  ;;  %3139 = vmatpush3.bf16.msra.mxu1 %v3657_v36 }
 0xe1d   :  { %v1503_v33 = vpop.permute.xlu1 %1502  ;;  %3140 = vmatprep.subr.bf16.mxu1 %v3455_v1 }
 0xe1e   :  { %2937 = vmatmul.mubr.msk.f32.vlgmr.msra.gmra.mrb[12].mxu0 %vm226_vm3, %v1503_v33 }
 0xe1f   :  { %3148 = vmatpush3.bf16.msra.mxu0 %v3604_v6  ;;  %2980 = vmatprep.mubr.msk.f32.mxu0 %vm3456_vm0, %v3457_v2 }
 0xe20   :  { %3149 = vmatprep.subr.bf16.mxu0 %v3455_v1 }
 0xe23   :  { %3151 = vmatpush3.bf16.msra.mxu0 %v3617_v11 }
 0xe24   :  { %3152 = vmatprep.subr.bf16.mxu0 %v3455_v1 }
 0xee9   :  { %v1667_v34 = vpop.f32.mrb[10].mxu1 }
 0xeea   :  { %v1672_v35 = vrot.slane %v1667_v34, 4  ;;  %v2949_v37 = vpop.f32.mrb[11].mxu1 }
 0xeec   :  { %v1674_v38 = vadd.f32 %v1672_v35, %v3819_v56 }
 0xeee   :  { %3299 = vtanh.f32 %v1674_v38  ;;  %v2625_v44 = vmul.f32 -1.442695, %v1674_v38 }
 0xef1   :  { %v1572_v39 = vpop.f32.mrb[12].mxu0 }
 0xef2   :  { %v3194_v40 = vadd.f32 %v3696_v53, %v1572_v39  ;;  %v2938_v12 = vpop.f32.mrb[13].mxu0 }
 0xef4   :  { %3301 = vtanh.f32 %v3194_v40  ;;  %v2623_v45 = vmul.f32 -1.442695, %v3194_v40 }
 0xef5   :  { %3303 = vpow2.f32 %v2625_v44 }
 0xef6   :  { %3305 = vpow2.f32 %v2623_v45 }
 0xef8   :  { %v3300_v41 = vpop.eup %3299 }
 0xef9   :  { %1687 = vrot.lane.b32.xlu0 %v3300_v41, %s3458_s14 }
 0xefe   :  { %v3302_v43 = vpop.eup %3301 }
 0xeff   :  { %1586 = vrot.lane.b32.xlu1 %v3302_v43, %s3458_s14  ;;  %v3304_v49 = vpop.eup %3303 }
 0xf00   :  { %v1678_v50 = vadd.f32 1.0, %v3304_v49  ;;  %v3306_v51 = vpop.eup %3305 }
 0xf01   :  { %v1580_v52 = vadd.f32 1.0, %v3306_v51 }
 0xf02   :  { %3307 = vrcp.f32 %v1678_v50 }
 0xf03   :  { %3309 = vrcp.f32 %v1580_v52 }
 0xf0c   :  { %v3308_v54 = vpop.eup %3307 }
 0xf0d   :  { %v3310_v57 = vpop.eup %3309  ;;  %v1685_v61 = vmul.f32 %v3308_v54, %v1683_v60 }
 0xf0e   :  { %v1584_v0 = vmul.f32 %v3310_v57, %v3832_v24 }
 0xf6b   :  { %v1688_v55 = vpop.permute.xlu0 %1687 }
 0xf6c   :  { %v1690_v56 = vmul.f32 %v3308_v54, %v1688_v55 }
 0xf6e   :  { %1692 = vrot.lane.b32.xlu0 %v1690_v56, %s3459_s4 }
 0xf71   :  { %v1587_v58 = vpop.permute.xlu1 %1586 }
 0xf72   :  { %v1589_v59 = vmul.f32 %v3310_v57, %v1587_v58 }
 0xf74   :  { %1591 = vrot.lane.b32.xlu1 %v1589_v59, %s3459_s4 }
 0xfe0   :  { %v1693_v62 = vpop.permute.xlu0 %1692 }
 0xfe1   :  { %v3867_v63 = vadd.f32 %v1693_v62, %v1685_v61 }
 0xfe3   :  { %3311 = vtanh.f32 %v3867_v63  ;;  %v1957_v35 = vrot.slane %v3867_v63, 4 }
 0xfe6   :  { %v1592_v3 = vpop.permute.xlu1 %1591 }
 0xfe7   :  { %v3871_v48 = vadd.f32 %v1592_v3, %v1584_v0 }
 0xfe9   :  { %3313 = vtanh.f32 %v3871_v48 }
 0xfed   :  { %v3312_v4 = vpop.eup %3311 }
 0xfee   :  { %1698 = vrot.lane.b32.xlu0 %v3312_v4, %s3458_s14 }
 0xff3   :  { %v3314_v5 = vpop.eup %3313 }
 0xff4   :  { %1597 = vrot.lane.b32.xlu1 %v3314_v5, %s3458_s14 }
0x1060   :  { %v1699_v7 = vpop.permute.xlu0 %1698 }
0x1061   :  { %v1701_v8 = vmul.f32 %v3308_v54, %v1699_v7 }
0x1063   :  { %v1703_v9 = vrot.slane %v1701_v8, 4 }
0x1065   :  { %1704 = vrot.lane.b32.xlu0 %v1703_v9, %s3459_s4 }
0x1066   :  { %v1598_v10 = vpop.permute.xlu1 %1597 }
0x1067   :  { %v1600_v14 = vmul.f32 %v3310_v57, %v1598_v10 }
0x1069   :  { %1779 = vrot.lane.b32.xlu1 %v1600_v14, %s3459_s4 }
0x10d7   :  { %v1705_v15 = vpop.permute.xlu0 %1704 }
0x10d8   :  { %2959 = vmatmul.mubr.msk.f32.vlgmr.msra.gmra.mrb[12].mxu1 %vm226_vm3, %v1705_v15  ;;  %2981 = vmatmul.mubr.msk.f32.vlgmr.msra.gmra.mrb[14].mxu0 %vm226_vm3, %v1705_v15 }
0x10d9   :  { %3142 = vmatpush3.bf16.msra.mxu1 %v3666_v42  ;;  %2969 = vmatprep.mubr.msk.f32.mxu1 %vm3456_vm0, %v3457_v2 }
0x10da   :  { %3143 = vmatprep.subr.bf16.mxu1 %v3455_v1  ;;  %3154 = vmatpush3.bf16.msra.mxu0 %v3649_v32 }
0x10db   :  { %3155 = vmatprep.subr.bf16.mxu0 %v3455_v1  ;;  %2991 = vmatprep.mubr.msk.f32.mxu0 %vm3456_vm0, %v3457_v2  ;;  %v1780_v16 = vpop.permute.xlu1 %1779 }
0x10dd   :  { %3145 = vmatpush3.bf16.msra.mxu1 %v3671_v46 }
0x10de   :  { %3164 = vmatprep.subr.bf16.mxu1 %v3455_v1  ;;  %3157 = vmatpush3.bf16.msra.mxu0 %v3657_v36 }
0x10df   :  { %3158 = vmatprep.subr.bf16.mxu0 %v3455_v1 }
0x10e0   :  { %2970 = vmatmul.mubr.msk.f32.vlgmr.msra.gmra.mrb[12].mxu1 %vm226_vm3, %v1780_v16 }
0x10e1   :  { %3166 = vmatpush3.bf16.msra.mxu1 %v3604_v6  ;;  %3013 = vmatprep.mubr.msk.f32.mxu1 %vm3456_vm0, %v3457_v2 }
0x10e2   :  { %3167 = vmatprep.subr.bf16.mxu1 %v3455_v1 }
0x10e5   :  { %3169 = vmatpush3.bf16.msra.mxu1 %v3617_v11 }
0x10e6   :  { %3170 = vmatprep.subr.bf16.mxu1 %v3455_v1 }
0x11ab   :  { %v1944_v18 = vpop.f32.mrb[14].mxu0 }
0x11ac   :  { %v1948_v19 = vadd.f32 %v1944_v18, %v3901_v17  ;;  %v2982_v20 = vpop.f32.mrb[15].mxu0 }
0x11ae   :  { %3315 = vtanh.f32 %v1948_v19  ;;  %v2630_v24 = vmul.f32 -1.442695, %v1948_v19 }
0x11b3   :  { %v1849_v21 = vpop.f32.mrb[12].mxu1 }
0x11b4   :  { %v3195_v6 = vadd.f32 %v3696_v53, %v1849_v21  ;;  %v2971_v22 = vpop.f32.mrb[13].mxu1 }
0x11b6   :  { %3317 = vtanh.f32 %v3195_v6  ;;  %v2628_v13 = vmul.f32 -1.442695, %v3195_v6 }
0x11b7   :  { %3319 = vpow2.f32 %v2630_v24 }
0x11b8   :  { %v3316_v23 = vpop.eup %3315  ;;  %3321 = vpow2.f32 %v2628_v13 }
0x11b9   :  { %1961 = vrot.lane.b32.xlu0 %v3316_v23, %s3458_s14 }
0x11c0   :  { %v3318_v11 = vpop.eup %3317 }
0x11c1   :  { %1863 = vrot.lane.b32.xlu1 %v3318_v11, %s3458_s14  ;;  %v3320_v47 = vpop.eup %3319 }
0x11c2   :  { %v1952_v25 = vadd.f32 1.0, %v3320_v47  ;;  %v3322_v26 = vpop.eup %3321 }
0x11c3   :  { %v1857_v27 = vadd.f32 1.0, %v3322_v26 }
0x11c4   :  { %3323 = vrcp.f32 %v1952_v25 }
0x11c5   :  { %3325 = vrcp.f32 %v1857_v27 }
0x11ce   :  { %v3324_v28 = vpop.eup %3323 }
0x11cf   :  { %v3326_v31 = vpop.eup %3325  ;;  %v1959_v37 = vmul.f32 %v3324_v28, %v1957_v35 }
0x11d0   :  { %v1861_v40 = vmul.f32 %v3326_v31, %v3871_v48 }
0x122b   :  { %v1962_v29 = vpop.permute.xlu0 %1961 }
0x122c   :  { %v1964_v30 = vmul.f32 %v3324_v28, %v1962_v29 }
0x122e   :  { %1966 = vrot.lane.b32.xlu0 %v1964_v30, %s3459_s4 }
0x1233   :  { %v1864_v33 = vpop.permute.xlu1 %1863 }
0x1234   :  { %v1866_v34 = vmul.f32 %v3326_v31, %v1864_v33 }
0x1236   :  { %1868 = vrot.lane.b32.xlu1 %v1866_v34, %s3459_s4 }
0x12a0   :  { %v1967_v38 = vpop.permute.xlu0 %1966 }
0x12a1   :  { %v3910_v39 = vadd.f32 %v1967_v38, %v1959_v37  ;;  %v2434_v38 = vld [vmem:[%s4010_s8 + $0x18] sm:$0xff] }
0x12a3   :  { %3327 = vtanh.f32 %v3910_v39  ;;  %v2233_v15 = vrot.slane %v3910_v39, 4  ;;  %v2431_v39 = vld [vmem:[%s4010_s8] sm:$0xff] }
0x12a8   :  { %v1869_v12 = vpop.permute.xlu1 %1868 }
0x12a9   :  { %v3914_v41 = vadd.f32 %v1869_v12, %v1861_v40  ;;  %v2433_v12 = vld [vmem:[%s4010_s8 + $0x10] sm:$0xff] }
0x12ab   :  { %3329 = vtanh.f32 %v3914_v41 }
0x12ad   :  { %v3328_v43 = vpop.eup %3327 }
0x12ae   :  { %1972 = vrot.lane.b32.xlu0 %v3328_v43, %s3458_s14  ;;  %v2438_v43 = vld [vmem:[%s4010_s8 + $0x38] sm:$0xff] }
0x12b5   :  { %v3330_v44 = vpop.eup %3329 }
0x12b6   :  { %1874 = vrot.lane.b32.xlu1 %v3330_v44, %s3458_s14  ;;  %v3184_v44 = vpack.c.bf16 %v2433_v12, %v2431_v39 }
0x1320   :  { %v1973_v45 = vpop.permute.xlu0 %1972 }
0x1321   :  { %v1975_v49 = vmul.f32 %v3324_v28, %v1973_v45 }
0x1323   :  { %1977 = vrot.lane.b32.xlu0 %v1975_v49, %s3459_s4  ;;  %v2435_v49 = vld [vmem:[%s4010_s8 + $0x20] sm:$0xff] }
0x1328   :  { %v1875_v50 = vpop.permute.xlu1 %1874 }
0x1329   :  { %v1877_v51 = vmul.f32 %v3326_v31, %v1875_v50  ;;  %v2437_v50 = vld [vmem:[%s4010_s8 + $0x30] sm:$0xff] }
0x132b   :  { %2052 = vrot.lane.b32.xlu1 %v1877_v51, %s3459_s4  ;;  %v3188_v51 = vpack.c.bf16 %v2437_v50, %v2435_v49 }
0x1395   :  { %v1978_v52 = vpop.permute.xlu0 %1977 }
0x1396   :  { %2992 = vmatmul.mubr.msk.f32.vlgmr.msra.gmra.mrb[16].mxu0 %vm226_vm3, %v1978_v52  ;;  %3014 = vmatmul.mubr.msk.f32.vlgmr.msra.gmra.mrb[14].mxu1 %vm226_vm3, %v1978_v52 }
0x1397   :  { %3160 = vmatpush3.bf16.msra.mxu0 %v3666_v42  ;;  %3002 = vmatprep.mubr.msk.f32.mxu0 %vm3456_vm0, %v3457_v2 }
0x1398   :  { %3161 = vmatprep.subr.bf16.mxu0 %v3455_v1  ;;  %3172 = vmatpush3.bf16.msra.mxu1 %v3649_v32 }
0x1399   :  { %3173 = vmatprep.subr.bf16.mxu1 %v3455_v1  ;;  %3024 = vmatprep.mubr.msk.f32.mxu1 %vm3456_vm0, %v3457_v2 }
0x139b   :  { %3163 = vmatpush3.bf16.msra.mxu0 %v3671_v46 }
0x139c   :  { %3175 = vmatpush3.bf16.msra.mxu1 %v3657_v36 }
0x139d   :  { %v2053_v54 = vpop.permute.xlu1 %2052  ;;  %3176 = vmatprep.subr.bf16.mxu1 %v3455_v1 }
0x139e   :  { %3003 = vmatmul.mubr.msk.f32.vlgmr.msra.gmra.mrb[16].mxu0 %vm226_vm3, %v2053_v54  ;;  %v2527_v54 = vld [vmem:[%s4003_s1] sm:$0xf] }
0x139f   :  { %2520 = vmatprep.mubr.f32.mxu0 %v3457_v2  ;;  %vm2528_vm4 = vcmp.ge.f32.partialorder %v2527_v54, 0.0 }
0x1469   :  { %v2217_v55 = vpop.f32.mrb[14].mxu1 }
0x146a   :  { %v2222_v56 = vrot.slane %v2217_v55, 4  ;;  %v3015_v57 = vpop.f32.mrb[15].mxu1  ;;  %v3460_v55 = vmov 0  }
0x146b   :  { %3226 = vset.pattern.permute.xlu0 %v3460_v55 }
0x146c   :  { %v2224_v32 = vadd.f32 %v2222_v56, %v3901_v17  ;;  %v2529_v56 = vmul.f32 0.01, %v2527_v54 }
0x146e   :  { %3331 = vtanh.f32 %v2224_v32  ;;  %v2635_v62 = vmul.f32 -1.442695, %v2224_v32  ;;  %v2530_v57 = vsel %vm2528_vm4, %v2527_v54, %v2529_v56 }
0x1471   :  { %v2122_v58 = vpop.f32.mrb[16].mxu0 }
0x1472   :  { %v3196_v59 = vadd.f32 %v3696_v53, %v2122_v58  ;;  %v3004_v60 = vpop.f32.mrb[17].mxu0 }
0x1474   :  { %3333 = vtanh.f32 %v3196_v59  ;;  %v2633_v63 = vmul.f32 -1.442695, %v3196_v59 }
0x1475   :  { %3335 = vpow2.f32 %v2635_v62 }
0x1476   :  { %3337 = vpow2.f32 %v2633_v63 }
0x1478   :  { %v3332_v61 = vpop.eup %3331 }
0x1479   :  { %2237 = vrot.lane.b32.xlu0 %v3332_v61, %s3458_s14 }
0x147e   :  { %v3334_v36 = vpop.eup %3333 }
0x147f   :  { %2136 = vrot.lane.b32.xlu1 %v3334_v36, %s3458_s14  ;;  %v3336_v0 = vpop.eup %3335  ;;  %v2441_v36 = vlaneseq }
0x1480   :  { %v2228_v3 = vadd.f32 1.0, %v3336_v0  ;;  %v3338_v48 = vpop.eup %3337 }
0x1481   :  { %v2130_v4 = vadd.f32 1.0, %v3338_v48  ;;  %v2442_v62 = vshrl.u32 %v2441_v36, 7  ;;  %v2439_v48 = vld [vmem:[%s4012_s10] sm:$0x3] }
0x1482   :  { %3339 = vrcp.f32 %v2228_v3  ;;  %v2531_v3 = vld [vmem:[%s4011_s9] sm:$0x3] }
0x1483   :  { %3341 = vrcp.f32 %v2130_v4  ;;  %v2443_v63 = vsub.s32 0, %v2442_v62  ;;  %v2447_v0 = vsub.s32 1, %v2442_v62 }
0x1485   :  { %v2541_v4 = vrot.slane %v2531_v3, %v2443_v63 }
0x148c   :  { %v3340_v5 = vpop.eup %3339 }
0x148d   :  { %v3342_v9 = vpop.eup %3341  ;;  %v2235_v16 = vmul.f32 %v3340_v5, %v2233_v15 }
0x148e   :  { %v2134_v19 = vmul.f32 %v3342_v9, %v3914_v41  ;;  %v2436_v41 = vld [vmem:[%s4010_s8 + $0x28] sm:$0xff] }
0x148f   :  { %v3186_v45 = vpack.c.bf16 %v2438_v43, %v2436_v41 }
0x14eb   :  { %v2238_v7 = vpop.permute.xlu0 %2237 }
0x14ec   :  { %v2240_v8 = vmul.f32 %v3340_v5, %v2238_v7 }
0x14ee   :  { %2242 = vrot.lane.b32.xlu0 %v2240_v8, %s3459_s4  ;;  %v2444_v8 = vrot.slane %v2439_v48, %v2443_v63 }
0x14f1   :  { %v2137_v10 = vpop.permute.xlu1 %2136 }
0x14f2   :  { %v2139_v14 = vmul.f32 %v3342_v9, %v2137_v10 }
0x14f4   :  { %2141 = vrot.lane.b32.xlu1 %v2139_v14, %s3459_s4 }
0x1560   :  { %v2243_v17 = vpop.permute.xlu0 %2242 }
0x1561   :  { %v2245_v18 = vadd.f32 %v2243_v17, %v2235_v16 }
0x1563   :  { %3343 = vtanh.f32 %v2245_v18  ;;  %v2558_v18 = vld [vmem:[%s4013_s11] sm:$0x3] }
0x1566   :  { %v2142_v20 = vpop.permute.xlu1 %2141 }
0x1567   :  { %v2144_v21 = vadd.f32 %v2142_v20, %v2134_v19 }
0x1569   :  { %3345 = vtanh.f32 %v2144_v21 }
0x156d   :  { %v3344_v6 = vpop.eup %3343 }
0x156e   :  { %2248 = vrot.lane.b32.xlu0 %v3344_v6, %s3458_s14  ;;  %v2563_v6 = vrot.slane %v2558_v18, %v2443_v63 }
0x1573   :  { %v3346_v22 = vpop.eup %3345 }
0x1574   :  { %2147 = vrot.lane.b32.xlu1 %v3346_v22, %s3458_s14 }
0x15e0   :  { %v2249_v23 = vpop.permute.xlu0 %2248 }
0x15e1   :  { %v2251_v11 = vmul.f32 %v3340_v5, %v2249_v23  ;;  %v2545_v5 = vrot.slane %v2531_v3, %v2447_v0  ;;  %v2567_v23 = vrot.slane %v2558_v18, %v2447_v0 }
0x15e3   :  { %v2253_v24 = vrot.slane %v2251_v11, 4 }
0x15e5   :  { %2254 = vrot.lane.b32.xlu0 %v2253_v24, %s3459_s4 }
0x15e6   :  { %v2148_v13 = vpop.permute.xlu1 %2147 }
0x15e7   :  { %v2150_v47 = vmul.f32 %v3342_v9, %v2148_v13  ;;  %v2448_v9 = vrot.slane %v2439_v48, %v2447_v0 }
0x15e9   :  { %2329 = vrot.lane.b32.xlu1 %v2150_v47, %s3459_s4 }
0x1657   :  { %v2255_v25 = vpop.permute.xlu0 %2254 }
0x1658   :  { %3025 = vmatmul.mubr.msk.f32.vlgmr.msra.gmra.mrb[16].mxu1 %vm226_vm3, %v2255_v25 }
0x1659   :  { %3178 = vmatpush3.bf16.msra.mxu1 %v3666_v42  ;;  %3035 = vmatprep.mubr.msk.f32.mxu1 %vm3456_vm0, %v3457_v2 }
0x165a   :  { %3179 = vmatprep.subr.bf16.mxu1 %v3455_v1 }
0x165b   :  { %v2330_v26 = vpop.permute.xlu1 %2329 }
0x165d   :  { %3181 = vmatpush3.bf16.msra.mxu1 %v3671_v46 }
0x1660   :  { %3036 = vmatmul.mubr.msk.f32.vlgmr.msra.gmra.mrb[16].mxu1 %vm226_vm3, %v2330_v26 }
0x1733   :  { %v2399_v27 = vpop.f32.mrb[16].mxu1 }
0x1734   :  { %v3197_v28 = vadd.f32 %v3696_v53, %v2399_v27  ;;  %v3037_v29 = vpop.f32.mrb[17].mxu1  ;;  %v2432_v53 = vld [vmem:[%s4010_s8 + $0x8] sm:$0xff] }
0x1735   :  { %v3182_v40 = vpack.c.bf16 %v2434_v38, %v2432_v53  ;;  %v2640_v29 = vld [vmem:[#allocation2] ss:$0 sm:$0xff] }
0x1736   :  { %3347 = vtanh.f32 %v3197_v28  ;;  %v2638_v31 = vmul.f32 -1.442695, %v3197_v28 }
0x1737   :  { %3183 = vmatprep.subr.bf16.mxu0 %v3182_v40 }
0x1738   :  { %3349 = vpow2.f32 %v2638_v31  ;;  %3185 = vmatpush1.bf16.msra.mxu0 %v3184_v44 }
0x1739   :  { %3187 = vmatprep.subr.bf16.mxu0 %v3186_v45 }
0x173c   :  { %3189 = vmatpush1.bf16.msra.mxu0 %v3188_v51 }
0x1740   :  { %v3348_v30 = vpop.eup %3347 }
0x1741   :  { %2413 = vrot.lane.b32.xlu0 %v3348_v30, %s3458_s14 }
0x1742   :  { %v3350_v42 = vpop.eup %3349 }
0x1743   :  { %v2407_v33 = vadd.f32 1.0, %v3350_v42 }
0x1745   :  { %3351 = vrcp.f32 %v2407_v33 }
0x174f   :  { %v3352_v2 = vpop.eup %3351 }
0x1750   :  { %v2411_v46 = vmul.f32 %v3352_v2, %v2144_v21 }
0x17b3   :  { %v2414_v1 = vpop.permute.xlu0 %2413 }
0x17b4   :  { %v2416_v34 = vmul.f32 %v3352_v2, %v2414_v1 }
0x17b6   :  { %2418 = vrot.lane.b32.xlu1 %v2416_v34, %s3459_s4 }
0x1828   :  { %v2419_v35 = vpop.permute.xlu1 %2418 }
0x1829   :  { %v2421_v37 = vadd.f32 %v2419_v35, %v2411_v46 }
0x182b   :  { %3353 = vtanh.f32 %v2421_v37 }
0x1835   :  { %v3354_v52 = vpop.eup %3353 }
0x1836   :  { %2424 = vrot.lane.b32.xlu0 %v3354_v52, %s3458_s14 }
0x183a   :  { %2534 = vperm.xlu0 %3226, %v2530_v57  }
0x18a8   :  { %v2425_v32 = vpop.permute.xlu0 %2424 }
0x18a9   :  { %v2427_v58 = vmul.f32 %v3352_v2, %v2425_v32 }
0x18ab   :  { %v2429_v59 = vmul.f32 0.01, %v2427_v58  ;;  %vm2428_vm5 = vcmp.ge.f32.partialorder %v2427_v58, 0.0 }
0x18ad   :  { %v2430_v60 = vsel %vm2428_vm5, %v2427_v58, %v2429_v59 }
0x18ae   :  { %2452 = vrot.lane.b32.xlu1 %v2430_v60, %s3459_s4 }
0x18b9   :  { %v2535_v7 = vpop.permute.xlu0 %2534 }
0x18ba   :  { %v2548_v10 = vmul.f32 %v2541_v4, %v2535_v7  ;;  %v2549_v15 = vmul.f32 %v2545_v5, %v2535_v7 }
0x1920   :  { %v2453_v61 = vpop.permute.xlu1 %2452 }
0x1921   :  { %2639 = vmatmul.mubr.msk.f32.vlgmr.msra.gmra.mrb[18].mxu0 %vm226_vm3, %v2453_v61 }
0x19f4   :  { %v2522_v14 = vpop.f32.mrb[18].mxu0 }
0x19f5   :  { %v2523_v16 = vadd.f32 %v2522_v14, %v2444_v8  ;;  %v2524_v17 = vpop.f32.mrb[19].mxu0 }
0x19f6   :  { %v2525_v19 = vadd.f32 %v2524_v17, %v2448_v9 }
0x19f7   :  { %v2550_v20 = vadd.f32 %v2548_v10, %v2523_v16 }
0x19f8   :  { %v2551_v21 = vadd.f32 %v2549_v15, %v2525_v19 }
0x19f9   :  { %vm2552_vm6 = vcmp.ge.f32.partialorder %v2550_v20, 0.0  ;;  %v2554_v22 = vmul.f32 0.01, %v2550_v20 }
0x19fa   :  { %vm2553_vm7 = vcmp.ge.f32.partialorder %v2551_v21, 0.0  ;;  %v2555_v11 = vmul.f32 0.01, %v2551_v21 }
0x19fb   :  { %v2556_v24 = vsel %vm2552_vm6, %v2550_v20, %v2554_v22 }
0x19fc   :  { %v2557_v13 = vsel %vm2553_vm7, %v2551_v21, %v2555_v11  ;;  %v2570_v47 = vmul.f32 %v2563_v6, %v2556_v24 }
0x19fd   :  { %v2571_v25 = vmul.f32 %v2567_v23, %v2557_v13 }
0x19fe   :  { %v2572_v26 = vsel %vm137_vm1, %v2570_v47, 0.0 }
0x19ff   :  { %v2573_v27 = vsel %vm137_vm1, %v2571_v25, 0.0 }
0x1a00   :  { %v2574_v28 = vadd.f32 %v2573_v27, %v2572_v26 }
0x1a02   :  { %2575 = vadd.xlane.f32.xlu1 %v2574_v28 }
0x1a8f   :  { %v2576_v30 = vpop.xlane.xlu1 %2575 }
0x1a90   :  { %v2584_v31 = vadd.f32 %v2640_v29, %v2576_v30 }
0x1a92   :  { %2586 = vst.msk [vmem:[%s4015_s13] sm:$0xf] %vm2585_vm8, %v2584_v31 }
0x1a93   :  { %2591 = vsyncpa [#allocation4], 1 }
0x1a94   :  { %2592 = vsyncpa [#allocation6], 1 }
0x1a95   :  { %2593 = vsyncpa [#allocation9], 1 }

</bundles_post_ra>
